<compile_context>
chip_gen: v7x
topology: tpu7x:2x2x1
jax: 0.10.0
libtpu: 0.0.40
codegen_flags: <defaults>
</compile_context>

<pallas_src>
import functools

import jax
import jax.numpy as jnp
from jax.experimental import pallas as pl
from jax.experimental.pallas import tpu as pltpu


# --------------------------------------------------------------------------- #
# Kernels
# --------------------------------------------------------------------------- #
def _mem_col_kernel(x_ref, proto_ref, out_ref, sim_ref, *, num_protos, shrink_thres):
    """Channels-first slab: x (C, T), proto (P_pad, C) -> out (C, T), sim (P, T)."""
    x = x_ref[...]                        # (C, T)   T lane-dense
    proto = proto_ref[...]                # (P_pad, C), zero padded, VMEM resident
    p_pad = proto.shape[0]

    # s[p, t] = sum_c proto[p, c] * x[c, t]   (MXU, f32 accumulation)
    s = jax.lax.dot_general(proto, x, (((1,), (0,)), ((), ())),
                            preferred_element_type=jnp.float32)     # (P_pad, T)

    if p_pad > num_protos:
        row = jax.lax.broadcasted_iota(jnp.int32, s.shape, 0)
        s = jnp.where(row < num_protos, s, -1e30)                   # mask pad rows

    # Softmax over the prototype (sublane) axis; padded rows -> exactly 0.
    m = jnp.max(s, axis=0, keepdims=True)
    e = jnp.exp(s - m)
    sim = e * pl.reciprocal(jnp.sum(e, axis=0, keepdims=True))

    if shrink_thres > 0.0:
        shifted = sim - shrink_thres
        sim = jnp.maximum(shifted, 0.0) * sim * pl.reciprocal(
            jnp.abs(shifted) + 1e-12)
        l1 = jnp.maximum(jnp.sum(jnp.abs(sim), axis=0, keepdims=True), 1e-12)
        sim = sim * pl.reciprocal(l1)

    sim_ref[...] = sim[:num_protos, :]                              # (P, T)
    # out[c, t] = sum_p proto[p, c] * sim[p, t]  (MXU, f32 accumulation)
    out_ref[...] = jax.lax.dot_general(proto, sim, (((0,), (0,)), ((), ())),
                                       preferred_element_type=jnp.float32)


def _mem_row_kernel(x_ref, proto_ref, out_ref, sim_ref, *, num_protos, shrink_thres):
    """Row slab: x (TILE_N, C), proto (P_pad, C) -> out (TILE_N, C), sim (TILE_N, P)."""
    x = x_ref[...]                        # (TILE_N, C)
    proto = proto_ref[...]                # (P_pad, C)
    p_pad = proto.shape[0]

    s = jax.lax.dot_general(x, proto, (((1,), (1,)), ((), ())),
                            preferred_element_type=jnp.float32)     # (TILE_N, P_pad)
    if p_pad > num_protos:
        col = jax.lax.broadcasted_iota(jnp.int32, s.shape, 1)
        s = jnp.where(col < num_protos, s, -1e30)

    m = jnp.max(s, axis=-1, keepdims=True)
    e = jnp.exp(s - m)
    sim = e * pl.reciprocal(jnp.sum(e, axis=-1, keepdims=True))

    if shrink_thres > 0.0:
        shifted = sim - shrink_thres
        sim = jnp.maximum(shifted, 0.0) * sim * pl.reciprocal(
            jnp.abs(shifted) + 1e-12)
        l1 = jnp.maximum(jnp.sum(jnp.abs(sim), axis=-1, keepdims=True), 1e-12)
        sim = sim * pl.reciprocal(l1)

    sim_ref[...] = sim[:, :num_protos]                              # (TILE_N, P)
    out_ref[...] = jnp.dot(sim, proto, preferred_element_type=jnp.float32)


# --------------------------------------------------------------------------- #
# Tile selection (divisor-based: avoid pad / slice HBM round trips)
# --------------------------------------------------------------------------- #
def _choose_row_tile(n, c, cap_bytes=2 << 20):
    """Row tile (multiple of 8 or full extent) targeting ~2 MiB slabs."""
    cap = max(8, min(n, (cap_bytes // (4 * c)) // 8 * 8))
    best, d = 0, 8
    while d <= cap:
        if n % d == 0:
            best = d
        d += 8
    if best == 0:
        if n <= cap:
            return n, 0                       # full-extent block (always legal)
    if best < min(128, cap) and n > cap:
        # Awkward large n: pad rows to a multiple of `cap` (rare fallback).
        return cap, (-n) % cap
    # Prefer >=2 grid steps so v7x can shard across both TensorCores.
    if n // best < 2:
        d, half = 8, 0
        while d <= n // 2:
            if n % d == 0:
                half = d
            d += 8
        if half:
            best = half
    return best, 0


def _choose_spatial_tile(hw, c, cap_bytes=2 << 20):
    """Spatial (lane) tile: multiple of 128 dividing H*W, or full extent."""
    cap = max(128, min(hw, (cap_bytes // (4 * c)) // 128 * 128))
    if hw % 128 == 0:
        best, d = 128, 128
        while d <= cap:
            if hw % d == 0:
                best = d
            d += 128
        return best, 0
    if hw <= max(cap, 1024):
        return hw, 0                          # small/awkward H*W: one full block
    pad = (-hw) % 128                         # rare fallback: pad spatial dim
    hw_p = hw + pad
    best, d = 128, 128
    while d <= min(cap, hw_p):
        if hw_p % d == 0:
            best = d
        d += 128
    return best, pad


def _pad_protos(proto):
    """Zero-pad the prototype table to a 128-multiple along P (MXU-friendly)."""
    p, _ = proto.shape
    p_pad = ((p + 127) // 128) * 128
    proto = proto.astype(jnp.float32)
    if p_pad > p:
        proto = jnp.pad(proto, ((0, p_pad - p), (0, 0)))
    return proto


_COMPILER_PARAMS = dict(vmem_limit_bytes=32 * 1024 * 1024)


# --------------------------------------------------------------------------- #
# Wrappers
# --------------------------------------------------------------------------- #
def _mem_forward_nchw(x, proto_pad, num_protos, shrink_thres):
    """branch=False path: x (B, C, H, W) -> out (B, C, H, W), sim (B, P, H, W)."""
    B, C, H, W = x.shape
    HW = H * W
    x3 = x.reshape(B, C, HW).astype(jnp.float32)      # contiguous reshape: free

    tile_hw, pad = _choose_spatial_tile(HW, C)
    if pad:
        x3 = jnp.pad(x3, ((0, 0), (0, 0), (0, pad)))  # rare fallback only
    hw_p = HW + pad
    n_tiles = hw_p // tile_hw
    if B * n_tiles < 2 and tile_hw % 256 == 0:        # keep both v7x TCs busy
        tile_hw //= 2
        n_tiles = hw_p // tile_hw

    P = num_protos
    P_pad = proto_pad.shape[0]
    kernel = functools.partial(_mem_col_kernel, num_protos=P,
                               shrink_thres=float(shrink_thres))

    out3, sim3 = pl.pallas_call(
        kernel,
        out_shape=(jax.ShapeDtypeStruct((B, C, hw_p), jnp.float32),
                   jax.ShapeDtypeStruct((B, P, hw_p), jnp.float32)),
        grid=(B, n_tiles),
        in_specs=[
            pl.BlockSpec((None, C, tile_hw), lambda b, j: (b, 0, j)),  # x slab
            pl.BlockSpec((P_pad, C), lambda b, j: (0, 0)),             # resident
        ],
        out_specs=(
            pl.BlockSpec((None, C, tile_hw), lambda b, j: (b, 0, j)),
            pl.BlockSpec((None, P, tile_hw), lambda b, j: (b, 0, j)),
        ),
        compiler_params=pltpu.CompilerParams(
            dimension_semantics=("parallel", "parallel"), **_COMPILER_PARAMS),
    )(x3, proto_pad)

    if pad:
        out3 = out3[..., :HW]
        sim3 = sim3[..., :HW]
    return out3.reshape(B, C, H, W), sim3.reshape(B, P, H, W)


def _mem_forward_rows(x, proto_pad, num_protos, shrink_thres):
    """branch=True path: x (B, T, C) -> out (B, T, C), sim (B, P, T)."""
    B, T, C = x.shape
    N = B * T
    x2 = x.reshape(N, C).astype(jnp.float32)          # contiguous reshape: free

    tile_n, pad = _choose_row_tile(N, C)
    if pad:
        x2 = jnp.pad(x2, ((0, pad), (0, 0)))          # rare fallback only
    n_p = N + pad

    P = num_protos
    P_pad = proto_pad.shape[0]
    kernel = functools.partial(_mem_row_kernel, num_protos=P,
                               shrink_thres=float(shrink_thres))

    out2, sim2 = pl.pallas_call(
        kernel,
        out_shape=(jax.ShapeDtypeStruct((n_p, C), jnp.float32),
                   jax.ShapeDtypeStruct((n_p, P), jnp.float32)),
        grid=(n_p // tile_n,),
        in_specs=[
            pl.BlockSpec((tile_n, C), lambda i: (i, 0)),
            pl.BlockSpec((P_pad, C), lambda i: (0, 0)),
        ],
        out_specs=(
            pl.BlockSpec((tile_n, C), lambda i: (i, 0)),
            pl.BlockSpec((tile_n, P), lambda i: (i, 0)),
        ),
        compiler_params=pltpu.CompilerParams(
            dimension_semantics=("parallel",), **_COMPILER_PARAMS),
    )(x2, proto_pad)

    if pad:
        out2 = out2[:N]
        sim2 = sim2[:N]
    out = out2.reshape(B, T, C)
    sim = sim2.reshape(B, T, P).transpose(0, 2, 1)    # tiny tensor (P << C)
    return out, sim


def mem_module_forward(X, proto, *, shrink_thres=0.0025, branch=False):
    """Pallas-backed MemModule.forward."""
    P, C = proto.shape
    proto_pad = _pad_protos(proto)
    if branch:
        out, sim = _mem_forward_rows(X, proto_pad, P, shrink_thres)
    else:
        assert X.shape[1] == C
        out, sim = _mem_forward_nchw(X, proto_pad, P, shrink_thres)
    return {"output": out, "similarity": sim}


# --------------------------------------------------------------------------- #
# Pure-JAX reference (mirrors the PyTorch forward)
# --------------------------------------------------------------------------- #
def mem_module_ref(X, proto, *, shrink_thres=0.0025, branch=False):
    P, C = proto.shape
    if branch:
        B = X.shape[0]
        x2 = X.reshape(-1, C)
    else:
        B, _, H, W = X.shape
        x2 = jnp.transpose(X, (0, 2, 3, 1)).reshape(-1, C)
    sim = jax.nn.softmax(x2 @ proto.T, axis=1)
    if shrink_thres > 0:
        shifted = sim - shrink_thres
        sim = jnp.maximum(shifted, 0.0) * sim / (jnp.abs(shifted) + 1e-12)
        sim = sim / jnp.maximum(jnp.sum(jnp.abs(sim), axis=1, keepdims=True), 1e-12)
    out = sim @ proto
    if branch:
        return out.reshape(B, -1, C), sim.reshape(B, -1, P).transpose(0, 2, 1)
    out = out.reshape(B, H, W, C).transpose(0, 3, 1, 2)
    sim = sim.reshape(B, H, W, P).transpose(0, 3, 1, 2)
    return out, sim


if __name__ == "__main__":
    num_protos = 20
    fea_dim = 512
    shrink_thres = 0.0025
    B, H, W = 2, 16, 16
    T = 8

    key = jax.random.PRNGKey(0)
    kx, kp, kb = jax.random.split(key, 3)

    # PyTorch init: proto ~ U(-stdv, stdv), stdv = 1/sqrt(fea_dim).
    stdv = 1.0 / (fea_dim ** 0.5)
    proto = jax.random.uniform(kp, (num_protos, fea_dim), jnp.float32,
                               minval=-stdv, maxval=stdv)

    # --- branch=False path (NCHW input) ---
    x = jax.random.normal(kx, (B, fea_dim, H, W), dtype=jnp.float32)
    res = mem_module_forward(x, proto, shrink_thres=shrink_thres, branch=False)
    jax.block_until_ready(res)
    out_ref, sim_ref = mem_module_ref(x, proto, shrink_thres=shrink_thres,
                                      branch=False)
    assert res["output"].shape == (B, fea_dim, H, W)
    assert res["similarity"].shape == (B, num_protos, H, W)
    assert jnp.allclose(res["output"], out_ref, atol=2e-5, rtol=2e-5)
    assert jnp.allclose(res["similarity"], sim_ref, atol=2e-5, rtol=2e-5)

    # --- branch=True path (B, T, C input) ---
    xb = jax.random.normal(kb, (B, T, fea_dim), dtype=jnp.float32)
    res_b = mem_module_forward(xb, proto, shrink_thres=shrink_thres, branch=True)
    jax.block_until_ready(res_b)
    out_ref_b, sim_ref_b = mem_module_ref(xb, proto, shrink_thres=shrink_thres,
                                          branch=True)
    assert res_b["output"].shape == (B, T, fea_dim)
    assert res_b["similarity"].shape == (B, num_protos, T)
    assert jnp.allclose(res_b["output"], out_ref_b, atol=2e-5, rtol=2e-5)
    assert jnp.allclose(res_b["similarity"], sim_ref_b, atol=2e-5, rtol=2e-5)

    print("KERNEL_OK")
</pallas_src>

<mosaic_0001>
module attributes {stable_mosaic.version = 11 : i64} {
  func.func @_mem_col_kernel(%arg0: i32, %arg1: i32, %arg2: memref<1x512x256xf32, #tpu.memory_space<vmem>>, %arg3: memref<128x512xf32, #tpu.memory_space<vmem>>, %arg4: memref<1x512x256xf32, #tpu.memory_space<vmem>>, %arg5: memref<1x20x256xf32, #tpu.memory_space<vmem>>) attributes {dimension_semantics = [#tpu.dimension_semantics<parallel>, #tpu.dimension_semantics<parallel>], iteration_bounds = array<i64: 2, 1>, scalar_prefetch = 0 : i64, scratch_operands = 0 : i64, tpu.core_type = #tpu.core_type<tc>, window_params = [{transform_indices = @transform_0, window_bounds = array<i64: 1, 512, 256>}, {pipeline_mode = #tpu.pipeline_mode<synchronous>, transform_indices = @transform_1, window_bounds = array<i64: 128, 512>}, {transform_indices = @transform_2, window_bounds = array<i64: 1, 512, 256>}, {transform_indices = @transform_3, window_bounds = array<i64: 1, 20, 256>}]} {
    %c0 = arith.constant 0 : index
    %c0_0 = arith.constant 0 : index
    %c0_1 = arith.constant 0 : index
    %0 = vector.load %arg2[%c0, %c0_0, %c0_1] : memref<1x512x256xf32, #tpu.memory_space<vmem>>, vector<1x512x256xf32>
    %1 = vector.shape_cast %0 : vector<1x512x256xf32> to vector<512x256xf32>
    %c0_2 = arith.constant 0 : index
    %c0_3 = arith.constant 0 : index
    %2 = vector.load %arg3[%c0_2, %c0_3] : memref<128x512xf32, #tpu.memory_space<vmem>>, vector<128x512xf32>
    %cst = arith.constant dense<0.000000e+00> : vector<128x256xf32>
    %3 = tpu.matmul %2, %1, %cst {dimension_numbers = #tpu.dot_dimension_numbers<[1], [0], [0], [1], [0, 0, 1, 1], [], []>} : vector<128x512xf32>, vector<512x256xf32>, vector<128x256xf32> -> vector<128x256xf32>
    %4 = tpu.iota {dimensions = array<i32: 0>} : vector<128x256xi32>
    %c20_i32 = arith.constant 20 : i32
    %5 = vector.broadcast %c20_i32 : i32 to vector<128x256xi32>
    %6 = arith.cmpi slt, %4, %5 : vector<128x256xi32>
    %cst_4 = arith.constant -1.000000e+30 : f32
    %7 = vector.broadcast %cst_4 : f32 to vector<128x256xf32>
    %8 = arith.select %6, %3, %7 : vector<128x256xi1>, vector<128x256xf32>
    %cst_5 = arith.constant dense<0xFF800000> : vector<256xf32>
    %9 = vector.multi_reduction <maximumf>, %8, %cst_5 [0] : vector<128x256xf32> to vector<256xf32>
    %10 = vector.shape_cast %9 : vector<256xf32> to vector<1x256xf32>
    %11 = vector.broadcast %10 : vector<1x256xf32> to vector<128x256xf32>
    %12 = arith.subf %8, %11 : vector<128x256xf32>
    %13 = math.exp %12 : vector<128x256xf32>
    %cst_6 = arith.constant dense<0.000000e+00> : vector<256xf32>
    %14 = vector.multi_reduction <add>, %13, %cst_6 [0] : vector<128x256xf32> to vector<256xf32>
    %15 = vector.shape_cast %14 : vector<256xf32> to vector<1x256xf32>
    %16 = tpu.reciprocal %15 : vector<1x256xf32> -> vector<1x256xf32>
    %17 = vector.broadcast %16 : vector<1x256xf32> to vector<128x256xf32>
    %18 = arith.mulf %13, %17 : vector<128x256xf32>
    %cst_7 = arith.constant 2.500000e-03 : f32
    %19 = vector.broadcast %cst_7 : f32 to vector<128x256xf32>
    %20 = arith.subf %18, %19 : vector<128x256xf32>
    %cst_8 = arith.constant 0.000000e+00 : f32
    %21 = vector.broadcast %cst_8 : f32 to vector<128x256xf32>
    %22 = arith.maximumf %20, %21 : vector<128x256xf32>
    %23 = arith.mulf %22, %18 : vector<128x256xf32>
    %24 = math.absf %20 : vector<128x256xf32>
    %cst_9 = arith.constant 9.99999996E-13 : f32
    %25 = vector.broadcast %cst_9 : f32 to vector<128x256xf32>
    %26 = arith.addf %24, %25 : vector<128x256xf32>
    %27 = tpu.reciprocal %26 : vector<128x256xf32> -> vector<128x256xf32>
    %28 = arith.mulf %23, %27 : vector<128x256xf32>
    %29 = math.absf %28 : vector<128x256xf32>
    %cst_10 = arith.constant dense<0.000000e+00> : vector<256xf32>
    %30 = vector.multi_reduction <add>, %29, %cst_10 [0] : vector<128x256xf32> to vector<256xf32>
    %31 = vector.shape_cast %30 : vector<256xf32> to vector<1x256xf32>
    %cst_11 = arith.constant 9.99999996E-13 : f32
    %32 = vector.broadcast %cst_11 : f32 to vector<1x256xf32>
    %33 = arith.maximumf %31, %32 : vector<1x256xf32>
    %34 = tpu.reciprocal %33 : vector<1x256xf32> -> vector<1x256xf32>
    %35 = vector.broadcast %34 : vector<1x256xf32> to vector<128x256xf32>
    %36 = arith.mulf %28, %35 : vector<128x256xf32>
    %37 = vector.extract_strided_slice %36 {offsets = [0, 0], sizes = [20, 256], strides = [1, 1]} : vector<128x256xf32> to vector<20x256xf32>
    %c0_12 = arith.constant 0 : index
    %c0_13 = arith.constant 0 : index
    %c0_14 = arith.constant 0 : index
    %38 = vector.load %arg5[%c0_12, %c0_13, %c0_14] : memref<1x20x256xf32, #tpu.memory_space<vmem>>, vector<1x20x256xf32>
    %39 = vector.shape_cast %38 : vector<1x20x256xf32> to vector<20x256xf32>
    %40 = vector.shape_cast %37 : vector<20x256xf32> to vector<1x20x256xf32>
    tpu.vector_store %arg5[%c0_12, %c0_13, %c0_14], %40 {strides = array<i32>} : memref<1x20x256xf32, #tpu.memory_space<vmem>>, vector<1x20x256xf32>,
    %cst_15 = arith.constant dense<0.000000e+00> : vector<512x256xf32>
    %41 = tpu.matmul %2, %36, %cst_15 {dimension_numbers = #tpu.dot_dimension_numbers<[0], [0], [1], [1], [0, 1, 1, 1], [], []>} : vector<128x512xf32>, vector<128x256xf32>, vector<512x256xf32> -> vector<512x256xf32>
    %c0_16 = arith.constant 0 : index
    %c0_17 = arith.constant 0 : index
    %c0_18 = arith.constant 0 : index
    %42 = vector.load %arg4[%c0_16, %c0_17, %c0_18] : memref<1x512x256xf32, #tpu.memory_space<vmem>>, vector<1x512x256xf32>
    %43 = vector.shape_cast %42 : vector<1x512x256xf32> to vector<512x256xf32>
    %44 = vector.shape_cast %41 : vector<512x256xf32> to vector<1x512x256xf32>
    tpu.vector_store %arg4[%c0_16, %c0_17, %c0_18], %44 {strides = array<i32>} : memref<1x512x256xf32, #tpu.memory_space<vmem>>, vector<1x512x256xf32>,
    return
  }
  func.func @transform_0(%arg0: i32, %arg1: i32) -> (i32, i32, i32) {
    %c0_i32 = arith.constant 0 : i32
    %c0_i32_0 = arith.constant 0 : i32
    return %arg0, %c0_i32, %arg1 : i32, i32, i32
  }
  func.func @transform_1(%arg0: i32, %arg1: i32) -> (i32, i32) {
    %c0_i32 = arith.constant 0 : i32
    %c0_i32_0 = arith.constant 0 : i32
    %c0_i32_1 = arith.constant 0 : i32
    return %c0_i32, %c0_i32_0 : i32, i32
  }
  func.func @transform_2(%arg0: i32, %arg1: i32) -> (i32, i32, i32) {
    %c0_i32 = arith.constant 0 : i32
    %c0_i32_0 = arith.constant 0 : i32
    return %arg0, %c0_i32, %arg1 : i32, i32, i32
  }
  func.func @transform_3(%arg0: i32, %arg1: i32) -> (i32, i32, i32) {
    %c0_i32 = arith.constant 0 : i32
    %c0_i32_0 = arith.constant 0 : i32
    return %arg0, %c0_i32, %arg1 : i32, i32, i32
  }
}

</mosaic_0001>

<bundles_post_ra>
// kernel: tpu_custom_call.1
= control target key start
LH: loop header
LB: loop body
LE: loop exit
PB: predicated region body
PF: predicated region fallthrough
CT: control target
= control target key end

     0   :  { %9 = vsyncpa [#allocation3], 0  ;;  %s3647_s0 = inlined_call_operand.hbm [shape: f32[2,512,256], index: 0, kind: input, shape index: {}]   ;;  %s3648_s1 = inlined_call_operand.hbm [shape: f32[128,512], index: 1, kind: input, shape index: {}]   ;;  %s3649_s2 = inlined_call_operand.hbm [shape: f32[2,512,256], index: 2, kind: output, shape index: {0}]   ;;  %s3650_s3 = inlined_call_operand.vmem [shape: f32[2,20,256], index: 3, kind: output, shape index: {1}]  }
   0x1   :  { %11 = vsyncpa [#allocation3 + $0x1], 0 }
   0x2   :  { %12 = vsyncpa [#allocation6], 0 }
   0x3   :  { %13 = vsyncpa [#allocation4], 0 }
   0x4   :  { %15 = vsyncpa [#allocation4 + $0x1], 0  ;;  %s2780_s12 = smov 0   ;;  %s2782_s13 = smov 0  }
   0x5   :  { %s2784_s14 = smov 0   ;;  %s2786_s15 = smov 0  }
   0x6   :  { %s2788_s16 = smov 0   ;;  %s2790_s17 = smov 0  }
   0x7 LB: > { %s2249_s18 = sadd.s32 4294967295, %s2748_s17   ;;  %s2250_s19 = sadd.s32 4294967294, %s2748_s17   ;;  %s2748_s17 = sphi %s2790_s17, %s21_s17   ;;  %s2744_s16 = sphi %s2788_s16, %s3674_s16   ;;  %s2740_s15 = sphi %s2786_s15, %s3673_s15   ;;  %s2736_s14 = sphi %s2784_s14, %s3672_s14   ;;  %s2732_s13 = sphi %s2782_s13, %s3671_s13   ;;  %s2728_s12 = sphi %s2780_s12, %s3670_s12  }
   0x8   : > { %p55_p0 = scmp.ne.s32.totalorder %s2732_s13, %s2728_s12  ;;  %p2814_p1 = scmp.eq.s32.totalorder %s2249_s18, 0 }
   0x9   : > { %p2818_p2 = scmp.eq.s32.totalorder %s2249_s18, 1  ;;  %p108_p3 = scmp.eq.s32.totalorder %s2250_s19, 1 }
   0xa   : > { %s3655_s20 = scalar_select %p2814_p1, 1, 0 }
   0xb   : > { %s3656_s21 = scalar_select %p2818_p2, 1, 0 }
   0xc   : > { %p2824_p4 = por %p2814_p1, %p55_p0  ;;  %p2251_p5 = scmp.ge.s32.totalorder %s2748_s17, 1 }
   0xd   : > { %p2829_p6 = por %p108_p3, %p55_p0  ;;  %p143_p7 = scmp.lt.s32.totalorder %s2748_s17, 3 }
   0xe   : > { %s3657_s22 = scalar_select %p2824_p4, 1, 0 }
   0xf   : > { %s3658_s23 = scalar_select %p2829_p6, 1, 0 }
  0x10   : > { %p2834_p8 = pnand %p2251_p5, %p143_p7  ;;  %s2750_s25 = smov [#allocation5]  }
  0x11   : > { %s155_s26 = sshll.u32 %s2750_s25, 4  ;;  %s33_s28 = sadd.s32 1, %s2744_s16  ;;  %s156_s26 = int_to_ptr.vmem [resolvable:$true] %s155_s26 }
  0x12   : > { %s3659_s24 = scalar_select %p2834_p8, 1, 0 }
  0x13   : > { %p2492_p9 = pneg %p2834_p8  ;;  %s2604_s4 = scalar_lea.hbm %s3648_s1, 8192 }
  0x14   : > { %p2605_p12 = scmp.ne.s32.totalorder %s3648_s1, %s2604_s4  ;;  %p2611_p5 = scmp.lt.u32.totalorder %s2604_s4, %s3648_s1 }
  0x15   : > { %p2843_p11 = pnand %p2492_p9, %p2814_p1 }
  0x17   : > { %p2606_p13 = pneg %p2843_p11 }
  0x19   : > { %p2607_p0 = pnand %p2606_p13, %p2605_p12 }
  0x1b   : > { %p2608_p3 = pneg %p2607_p0 }
  0x1d   : > { %p2613_p7 = pnand %p2611_p5, %p2608_p3 }
  0x1f   : > { %2616 = shalt.err (!%p2613_p7)
}
  0x20   : > { %s2617_s9 = scalar_lea.vmem %s156_s26, 8192  ;;  %p2625_p1 = scmp.lt.s32.totalorder %s156_s26, %s156_s26 }
  0x21   : > { %p2618_p9 = scmp.ne.s32.totalorder %s156_s26, %s2617_s9  ;;  %p2626_p4 = scmp.lt.s32.totalorder %s2617_s9, %s2617_s9 }
  0x23   : > { %p2620_p10 = pnand %p2618_p9, %p2606_p13  ;;  %p2627_p8 = por %p2626_p4, %p2625_p1 }
  0x25   : > { %p2621_p6 = pneg %p2620_p10 }
  0x27   : > { %p2628_p2 = pnand %p2627_p8, %p2621_p6 }
  0x29   : > { %2631 = shalt.err (!%p2628_p2)
}
  0x2a   : > { %s2751_s10 = smov 512   ;;  %s2752_s11 = smov 32  }
  0x2b   : > { %2495 = dma.hbm_to_vmem [thread:$0]  (!%p2843_p11), %s3648_s1, 8192, %s156_s26, [#allocation6], %s2751_s10, %s2751_s10, %s2752_s11  }
  0x2c   : > { %p35_p1 = scmp.ge.s32.totalorder %s33_s28, 2  ;;  %s42_s25 = sadd.s32 1, %s2736_s14 }
  0x2d   : > { %p49_p2 = scmp.ne.s32.totalorder %s2736_s14, %s2732_s13  ;;  %p50_p4 = scmp.eq.s32.totalorder %s2748_s17, 0 }
  0x2e   : > { %s3676_s28 = smov (%p35_p1, %s33_s28), 0  ;;  %p3662_p8 = scmp.ne.s32.totalorder %s3656_s21, 0 }
  0x2f   : > { %p2870_p6 = por %p50_p4, %p49_p2  ;;  %s37_s27 = ssub.s32 %s2744_s16, %s3676_s28 }
  0x30   : > { %p2876_p10 = por %p3662_p8, %p49_p2  ;;  %p2505_p12 = scmp.lt.s32.totalorder %s2748_s17, 2 }
  0x31   : > { %p40_p11 = scmp.eq.s32.totalorder %s37_s27, 0  ;;  %s169_s26 = sand.u32 1, %s2736_s14  }
  0x32   : > { %s2254_s4 = sshll.u32 %s169_s26, 10  ;;  %s2299_s6 = sshll.u32 %s2744_s16, 14 }
  0x33   : > { %s2885_s5 = scalar_select %p40_p11, %s2736_s14, %s42_s25  }
  0x34   : > { %s2891_s9 = scalar_lea.hbm %s3647_s0, %s2299_s6  ;;  %s173_s21 = scalar_lea.vmem [#allocation2], %s2254_s4 }
  0x35   : > { %s182_s10 = sshll.u32 %s173_s21, 4  ;;  %p2897_p13 = pnand %p2505_p12, %p2870_p6  ;;  %s2893_s10 = int_to_ptr.vmem [resolvable:$true] %s182_s10 }
  0x36   : > { %s2901_s18 = scalar_lea.sflag [#allocation3], %s169_s26  ;;  %s2632_s19 = scalar_lea.hbm %s2891_s9, 16384 }
  0x37   : > { %p2633_p0 = scmp.ne.s32.totalorder %s2891_s9, %s2632_s19  ;;  %p2634_p3 = pneg %p2897_p13 }
  0x38   : > { %s2637_s29 = scalar_lea.hbm %s3647_s0, 32768  ;;  %p2638_p9 = scmp.lt.u32.totalorder %s2891_s9, %s3647_s0 }
  0x39   : > { %p2635_p5 = pnand %p2634_p3, %p2633_p0  ;;  %p2639_p1 = scmp.lt.u32.totalorder %s2637_s29, %s2632_s19 }
  0x3a   : > { %p2641_p4 = scmp.lt.u32.totalorder %s2632_s19, %s2891_s9 }
  0x3b   : > { %p2636_p7 = pneg %p2635_p5  ;;  %p2640_p2 = por %p2639_p1, %p2638_p9 }
  0x3d   : > { %p2642_p6 = por %p2641_p4, %p2640_p2 }
  0x3f   : > { %p2643_p8 = pnand %p2642_p6, %p2636_p7 }
  0x41   : > { %2646 = shalt.err (!%p2643_p8)
}
  0x42   : > { %s2647_s26 = scalar_lea.vmem %s2893_s10, 16384  ;;  %s2753_s7 = smov [#allocation2]  }
  0x43   : > { %p2648_p12 = scmp.ne.s32.totalorder %s2893_s10, %s2647_s26  ;;  %s2652_s8 = sshll.u32 %s2753_s7, 4  ;;  %s2653_s8 = int_to_ptr.vmem [resolvable:$false] %s2652_s8 }
  0x44   : > { %s2654_s21 = scalar_lea.vmem %s2653_s8, 32768  ;;  %p2655_p5 = scmp.lt.s32.totalorder %s2893_s10, %s2653_s8 }
  0x45   : > { %p2650_p11 = pnand %p2648_p12, %p2634_p3  ;;  %p2656_p9 = scmp.lt.s32.totalorder %s2654_s21, %s2647_s26 }
  0x47   : > { %p2651_p0 = pneg %p2650_p11  ;;  %p2657_p1 = por %p2656_p9, %p2655_p5 }
  0x49   : > { %p2658_p2 = pnand %p2657_p1, %p2651_p0 }
  0x4b   : > { %2661 = shalt.err (!%p2658_p2)
}
  0x4c   : > { %s2754_s19 = smov 256   ;;  %s2755_s25 = smov 16  }
  0x4d   : > { %2499 = dma.hbm_to_vmem [thread:$0]  (!%p2897_p13), %s2891_s9, 16384, %s2893_s10, %s2901_s18, %s2754_s19, %s2754_s19, %s2755_s25  }
  0x4e   : > { %p3665_p3 = scmp.ne.s32.totalorder %s3659_s24, 0 }
  0x4f   : > { %s2932_s27 = sand.u32 (!%p3665_p3), 1, %s2732_s13   ;;  %p3666_p7 = scmp.ne.s32.totalorder (!%p3665_p3), %s3657_s22, 0 }
  0x50   : > { %194 = sbr.rel (%p3665_p3) target bundleno = 1095 (0x447), region = 28  ;;  %s2258_s29 = sshll.u32 (!%p3665_p3), %s2932_s27, 10 }
  0x51   : > { %s197_s4 = scalar_lea.sflag (!%p3665_p3), [#allocation3], %s2932_s27  ;;  %s2938_s6 = scalar_lea.vmem (!%p3665_p3), [#allocation2], %s2258_s29 }
  0x57   : > { %2715 = dma.done.wait (%p3666_p7), %s197_s4, 16384  }
  0x58   : > { %2717 = vsyncadd (%p3666_p7), %s197_s4, 4294950912  ;;  %p3667_p13 = scmp.ne.s32.totalorder %s3655_s20, 0 }
  0x5a   : > { %2719 = dma.done.wait (%p3667_p13), [#allocation6], 8192  }
  0x5b   : > { %2721 = vsyncadd (%p3667_p13), [#allocation6], 4294959104  ;;  %v249_v0 = vld [vmem:[%s2938_s6 + $0x8] sm:$0xff]  ;;  %v251_v1 = vld [vmem:[%s2938_s6 + $0x18] sm:$0xff]  ;;  %p239_p4 = scmp.lt.s32.totalorder %s2740_s15, 1  ;;  %s3461_s11 = scalar_lea.vmem [#allocation7], %s2258_s29 }
  0x5c   : > { %v248_v2 = vld [vmem:[%s2938_s6] sm:$0xff]  ;;  %v2301_v3 = vpack.c.bf16 %v251_v1, %v249_v0  ;;  %v250_v4 = vld [vmem:[%s2938_s6 + $0x10] sm:$0xff]  ;;  %v253_v5 = vld [vmem:[%s2938_s6 + $0x28] sm:$0xff]  ;;  %s2300_s18 = sshll.u32 %s2740_s15, 14  ;;  %s2111_s26 = sshll.u32 %s3461_s11, 4  ;;  %s3596_s26 = int_to_ptr.vmem [resolvable:$true] %s2111_s26 }
  0x5d   : > { %v255_v6 = vld [vmem:[%s2938_s6 + $0x38] sm:$0xff]  ;;  %v2303_v7 = vpack.c.bf16 %v250_v4, %v248_v2  ;;  %v252_v9 = vld [vmem:[%s2938_s6 + $0x20] sm:$0xff]  ;;  %v254_v10 = vld [vmem:[%s2938_s6 + $0x30] sm:$0xff]  ;;  %s240_s20 = scalar_select %p239_p4, %s2740_s15, 1 }
  0x5e   : > { %v2305_v8 = vpack.c.bf16 %v255_v6, %v253_v5  ;;  %v257_v11 = vld [vmem:[%s2938_s6 + $0x48] sm:$0xff]  ;;  %2302 = vmatprep.subr.bf16.mxu0 %v2301_v3  ;;  %v259_v12 = vld [vmem:[%s2938_s6 + $0x58] sm:$0xff]  ;;  %v2307_v13 = vpack.c.bf16 %v254_v10, %v252_v9  ;;  %v256_v15 = vld [vmem:[%s2938_s6 + $0x40] sm:$0xff]  ;;  %s3594_s21 = scalar_lea.hbm %s3649_s2, %s2300_s18  ;;  %s2087_s19 = scalar_lea.sflag [#allocation4], %s2932_s27 }
  0x5f   : > { %2304 = vmatpush1.bf16.msra.mxu0 %v2303_v7  ;;  %v2309_v14 = vpack.c.bf16 %v259_v12, %v257_v11  ;;  %v258_v16 = vld [vmem:[%s2938_s6 + $0x50] sm:$0xff]  ;;  %v261_v17 = vld [vmem:[%s2938_s6 + $0x68] sm:$0xff]  ;;  %v263_v18 = vld [vmem:[%s2938_s6 + $0x78] sm:$0xff]  ;;  %s2483_s22 = smul.u32 48, %s240_s20  ;;  %s2662_s15 = scalar_lea.vmem %s3596_s26, 16384 }
  0x60   : > { %2306 = vmatprep.subr.bf16.mxu0 %v2305_v8  ;;  %v2311_v19 = vpack.c.bf16 %v258_v16, %v256_v15  ;;  %v2313_v20 = vpack.c.bf16 %v263_v18, %v261_v17  ;;  %v260_v21 = vld [vmem:[%s2938_s6 + $0x60] sm:$0xff]  ;;  %v262_v22 = vld [vmem:[%s2938_s6 + $0x70] sm:$0xff]  ;;  %v265_v23 = vld [vmem:[%s2938_s6 + $0x88] sm:$0xff]  ;;  %p2663_p6 = scmp.ne.s32.totalorder %s3596_s26, %s2662_s15  ;;  %s2757_s25 = smov [#allocation7]  }
  0x61   : > { %v267_v24 = vld [vmem:[%s2938_s6 + $0x98] sm:$0xff]  ;;  %v2315_v25 = vpack.c.bf16 %v262_v22, %v260_v21  ;;  %v264_v27 = vld [vmem:[%s2938_s6 + $0x80] sm:$0xff]  ;;  %v266_v28 = vld [vmem:[%s2938_s6 + $0x90] sm:$0xff]  ;;  %s246_s10 = scalar_lea.vmem %s3650_s3, %s2483_s22  ;;  %s2666_s29 = sshll.u32 %s2757_s25, 4  ;;  %s2667_s29 = int_to_ptr.vmem [resolvable:$false] %s2666_s29 }
  0x62   : > { %v2317_v26 = vpack.c.bf16 %v267_v24, %v265_v23  ;;  %v269_v29 = vld [vmem:[%s2938_s6 + $0xa8] sm:$0xff]  ;;  %v271_v30 = vld [vmem:[%s2938_s6 + $0xb8] sm:$0xff]  ;;  %v2319_v31 = vpack.c.bf16 %v266_v28, %v264_v27  ;;  %v268_v33 = vld [vmem:[%s2938_s6 + $0xa0] sm:$0xff]  ;;  %p2664_p8 = pnand %p2663_p6, %p2876_p10  ;;  %s2668_s4 = scalar_lea.vmem %s2667_s29, 32768 }
  0x63   : > { %2308 = vmatpush1.bf16.msra.mxu0 %v2307_v13  ;;  %v2321_v32 = vpack.c.bf16 %v271_v30, %v269_v29  ;;  %v270_v34 = vld [vmem:[%s2938_s6 + $0xb0] sm:$0xff]  ;;  %v273_v35 = vld [vmem:[%s2938_s6 + $0xc8] sm:$0xff]  ;;  %v275_v36 = vld [vmem:[%s2938_s6 + $0xd8] sm:$0xff]  ;;  %p2669_p11 = scmp.lt.s32.totalorder %s3596_s26, %s2667_s29  ;;  %p2670_p0 = scmp.lt.s32.totalorder %s2668_s4, %s2662_s15 }
  0x64   : > { %2310 = vmatprep.subr.bf16.mxu0 %v2309_v14  ;;  %v2323_v37 = vpack.c.bf16 %v270_v34, %v268_v33  ;;  %v272_v38 = vld [vmem:[%s2938_s6 + $0xc0] sm:$0xff]  ;;  %v2325_v39 = vpack.c.bf16 %v275_v36, %v273_v35  ;;  %v274_v40 = vld [vmem:[%s2938_s6 + $0xd0] sm:$0xff]  ;;  %v377_v41 = vld [vmem:[#allocation5 + $0x8] sm:$0xff]  ;;  %p2665_p12 = pneg %p2664_p8 }
  0x65   : > { %v2976_v42 = vld [vmem:[#allocation5] sm:$0xff]  ;;  %v277_v43 = vld [vmem:[%s2938_s6 + $0xe8] sm:$0xff]  ;;  %v279_v44 = vld [vmem:[%s2938_s6 + $0xf8] sm:$0xff]  ;;  %504 = vmatprep.mubr.f32.mxu0 %v377_v41  ;;  %1413 = vxpose.xlu1.b32.start [1/16] %v377_v41, 128  ;;  %v2327_v45 = vpack.c.bf16 %v274_v40, %v272_v38  ;;  %p2671_p5 = por %p2670_p0, %p2669_p11 }
  0x66   : > { %1381 = vxpose.xlu0.b32.start [1/16] %v2976_v42, 128  ;;  %v2329_v46 = vpack.c.bf16 %v279_v44, %v277_v43  ;;  %v276_v47 = vld [vmem:[%s2938_s6 + $0xe0] sm:$0xff]  ;;  %v278_v48 = vld [vmem:[%s2938_s6 + $0xf0] sm:$0xff]  ;;  %v281_v50 = vld [vmem:[%s2938_s6 + $0x108] sm:$0xff] }
  0x67   : > { %2312 = vmatpush1.bf16.msra.mxu0 %v2311_v19  ;;  %v2983_v49 = vld [vmem:[#allocation5 + $0x20] sm:$0xff]  ;;  %v283_v51 = vld [vmem:[%s2938_s6 + $0x118] sm:$0xff]  ;;  %v2987_v52 = vld [vmem:[#allocation5 + $0x28] sm:$0xff]  ;;  %v2331_v53 = vpack.c.bf16 %v278_v48, %v276_v47  ;;  %p2672_p9 = pnand %p2671_p5, %p2665_p12 }
  0x68   : > { %2314 = vmatprep.subr.bf16.mxu0 %v2313_v20  ;;  %v2333_v54 = vpack.c.bf16 %v283_v51, %v281_v50  ;;  %v280_v55 = vld [vmem:[%s2938_s6 + $0x100] sm:$0xff]  ;;  %v282_v56 = vld [vmem:[%s2938_s6 + $0x110] sm:$0xff]  ;;  %v285_v58 = vld [vmem:[%s2938_s6 + $0x128] sm:$0xff] }
  0x69   : > { %1414 = vxpose.xlu1.b32.cont [2/16] %v2987_v52, 128  ;;  %v2993_v57 = vld [vmem:[#allocation5 + $0x40] sm:$0xff]  ;;  %v287_v59 = vld [vmem:[%s2938_s6 + $0x138] sm:$0xff]  ;;  %v2997_v60 = vld [vmem:[#allocation5 + $0x48] sm:$0xff]  ;;  %v2335_v61 = vpack.c.bf16 %v282_v56, %v280_v55 }
  0x6a   : > { %1382 = vxpose.xlu0.b32.cont [2/16] %v2983_v49, 128  ;;  %v2337_v62 = vpack.c.bf16 %v287_v59, %v285_v58  ;;  %v284_v63 = vld [vmem:[%s2938_s6 + $0x120] sm:$0xff]  ;;  %v286_v0 = vld [vmem:[%s2938_s6 + $0x130] sm:$0xff]  ;;  %v289_v2 = vld [vmem:[%s2938_s6 + $0x148] sm:$0xff] }
  0x6b   : > { %2316 = vmatpush1.bf16.msra.mxu0 %v2315_v25  ;;  %v3003_v1 = vld [vmem:[#allocation5 + $0x60] sm:$0xff]  ;;  %v291_v3 = vld [vmem:[%s2938_s6 + $0x158] sm:$0xff]  ;;  %v3007_v4 = vld [vmem:[#allocation5 + $0x68] sm:$0xff]  ;;  %v2339_v5 = vpack.c.bf16 %v286_v0, %v284_v63 }
  0x6c   : > { %2318 = vmatprep.subr.bf16.mxu0 %v2317_v26  ;;  %v2341_v6 = vpack.c.bf16 %v291_v3, %v289_v2  ;;  %v288_v7 = vld [vmem:[%s2938_s6 + $0x140] sm:$0xff]  ;;  %v290_v8 = vld [vmem:[%s2938_s6 + $0x150] sm:$0xff]  ;;  %v293_v10 = vld [vmem:[%s2938_s6 + $0x168] sm:$0xff] }
  0x6d   : > { %1415 = vxpose.xlu1.b32.cont [3/16] %v2997_v60, 128  ;;  %v3013_v9 = vld [vmem:[#allocation5 + $0x80] sm:$0xff]  ;;  %v295_v11 = vld [vmem:[%s2938_s6 + $0x178] sm:$0xff]  ;;  %v3017_v12 = vld [vmem:[#allocation5 + $0x88] sm:$0xff]  ;;  %v2343_v13 = vpack.c.bf16 %v290_v8, %v288_v7 }
  0x6e   : > { %1383 = vxpose.xlu0.b32.cont [3/16] %v2993_v57, 128  ;;  %v2345_v14 = vpack.c.bf16 %v295_v11, %v293_v10  ;;  %v292_v15 = vld [vmem:[%s2938_s6 + $0x160] sm:$0xff]  ;;  %v294_v16 = vld [vmem:[%s2938_s6 + $0x170] sm:$0xff]  ;;  %v297_v18 = vld [vmem:[%s2938_s6 + $0x188] sm:$0xff] }
  0x6f   : > { %2320 = vmatpush1.bf16.msra.mxu0 %v2319_v31  ;;  %v3023_v17 = vld [vmem:[#allocation5 + $0xa0] sm:$0xff]  ;;  %v299_v19 = vld [vmem:[%s2938_s6 + $0x198] sm:$0xff]  ;;  %v3027_v20 = vld [vmem:[#allocation5 + $0xa8] sm:$0xff]  ;;  %v2347_v21 = vpack.c.bf16 %v294_v16, %v292_v15 }
  0x70   : > { %2322 = vmatprep.subr.bf16.mxu0 %v2321_v32  ;;  %v2349_v22 = vpack.c.bf16 %v299_v19, %v297_v18  ;;  %v296_v23 = vld [vmem:[%s2938_s6 + $0x180] sm:$0xff]  ;;  %v298_v24 = vld [vmem:[%s2938_s6 + $0x190] sm:$0xff]  ;;  %v301_v26 = vld [vmem:[%s2938_s6 + $0x1a8] sm:$0xff] }
  0x71   : > { %1416 = vxpose.xlu1.b32.cont [4/16] %v3007_v4, 128  ;;  %v3033_v25 = vld [vmem:[#allocation5 + $0xc0] sm:$0xff]  ;;  %v303_v27 = vld [vmem:[%s2938_s6 + $0x1b8] sm:$0xff]  ;;  %v3037_v28 = vld [vmem:[#allocation5 + $0xc8] sm:$0xff]  ;;  %v2351_v29 = vpack.c.bf16 %v298_v24, %v296_v23 }
  0x72   : > { %1384 = vxpose.xlu0.b32.cont [4/16] %v3003_v1, 128  ;;  %v2353_v30 = vpack.c.bf16 %v303_v27, %v301_v26  ;;  %v300_v31 = vld [vmem:[%s2938_s6 + $0x1a0] sm:$0xff]  ;;  %v302_v32 = vld [vmem:[%s2938_s6 + $0x1b0] sm:$0xff]  ;;  %v305_v34 = vld [vmem:[%s2938_s6 + $0x1c8] sm:$0xff] }
  0x73   : > { %2324 = vmatpush1.bf16.msra.mxu0 %v2323_v37  ;;  %v3043_v33 = vld [vmem:[#allocation5 + $0xe0] sm:$0xff]  ;;  %v307_v35 = vld [vmem:[%s2938_s6 + $0x1d8] sm:$0xff]  ;;  %v3047_v36 = vld [vmem:[#allocation5 + $0xe8] sm:$0xff]  ;;  %v2355_v37 = vpack.c.bf16 %v302_v32, %v300_v31 }
  0x74   : > { %2326 = vmatprep.subr.bf16.mxu0 %v2325_v39  ;;  %v2357_v38 = vpack.c.bf16 %v307_v35, %v305_v34  ;;  %v304_v39 = vld [vmem:[%s2938_s6 + $0x1c0] sm:$0xff]  ;;  %v306_v40 = vld [vmem:[%s2938_s6 + $0x1d0] sm:$0xff]  ;;  %v309_v43 = vld [vmem:[%s2938_s6 + $0x1e8] sm:$0xff] }
  0x75   : > { %1417 = vxpose.xlu1.b32.cont [5/16] %v3017_v12, 128  ;;  %v3053_v41 = vld [vmem:[#allocation5 + $0x100] sm:$0xff]  ;;  %v311_v44 = vld [vmem:[%s2938_s6 + $0x1f8] sm:$0xff]  ;;  %v310_v50 = vld [vmem:[%s2938_s6 + $0x1f0] sm:$0xff] }
  0x76   : > { %1385 = vxpose.xlu0.b32.cont [5/16] %v3013_v9, 128  ;;  %v2361_v47 = vpack.c.bf16 %v311_v44, %v309_v43  ;;  %v308_v48 = vld [vmem:[%s2938_s6 + $0x1e0] sm:$0xff]  ;;  %v3067_v55 = vld [vmem:[#allocation5 + $0x128] sm:$0xff]  ;;  %v319_v0 = vld [vmem:[%s2938_s6 + $0x238] sm:$0xff] }
  0x77   : > { %2328 = vmatpush1.bf16.msra.mxu0 %v2327_v45  ;;  %v3057_v45 = vld [vmem:[#allocation5 + $0x108] sm:$0xff]  ;;  %v3063_v51 = vld [vmem:[#allocation5 + $0x120] sm:$0xff]  ;;  %v2363_v56 = vpack.c.bf16 %v310_v50, %v308_v48  ;;  %v318_v7 = vld [vmem:[%s2938_s6 + $0x230] sm:$0xff] }
  0x78   : > { %2330 = vmatprep.subr.bf16.mxu0 %v2329_v46  ;;  %v2359_v46 = vpack.c.bf16 %v306_v40, %v304_v39  ;;  %v312_v59 = vld [vmem:[%s2938_s6 + $0x200] sm:$0xff]  ;;  %v317_v63 = vld [vmem:[%s2938_s6 + $0x228] sm:$0xff]  ;;  %v323_v11 = vld [vmem:[%s2938_s6 + $0x258] sm:$0xff] }
  0x79   : > { %1418 = vxpose.xlu1.b32.cont [6/16] %v3027_v20, 128  ;;  %v3077_v2 = vld [vmem:[#allocation5 + $0x148] sm:$0xff]  ;;  %v3083_v8 = vld [vmem:[#allocation5 + $0x160] sm:$0xff]  ;;  %v322_v18 = vld [vmem:[%s2938_s6 + $0x250] sm:$0xff] }
  0x7a   : > { %1386 = vxpose.xlu0.b32.cont [6/16] %v3023_v17, 128  ;;  %v321_v10 = vld [vmem:[%s2938_s6 + $0x248] sm:$0xff]  ;;  %v320_v16 = vld [vmem:[%s2938_s6 + $0x240] sm:$0xff]  ;;  %v326_v26 = vld [vmem:[%s2938_s6 + $0x270] sm:$0xff] }
  0x7b   : > { %2332 = vmatpush1.bf16.msra.mxu0 %v2331_v53  ;;  %v313_v53 = vld [vmem:[%s2938_s6 + $0x208] sm:$0xff]  ;;  %v2373_v15 = vpack.c.bf16 %v323_v11, %v321_v10  ;;  %v3095_v19 = vld [vmem:[#allocation5 + $0x180] sm:$0xff]  ;;  %v330_v34 = vld [vmem:[%s2938_s6 + $0x290] sm:$0xff] }
  0x7c   : > { %2334 = vmatprep.subr.bf16.mxu0 %v2333_v54  ;;  %v315_v54 = vld [vmem:[%s2938_s6 + $0x218] sm:$0xff]  ;;  %v3099_v23 = vld [vmem:[#allocation5 + $0x188] sm:$0xff]  ;;  %v324_v24 = vld [vmem:[%s2938_s6 + $0x260] sm:$0xff] }
  0x7d   : > { %1419 = vxpose.xlu1.b32.cont [7/16] %v3037_v28, 128  ;;  %v2365_v58 = vpack.c.bf16 %v315_v54, %v313_v53  ;;  %v3107_v27 = vld [vmem:[#allocation5 + $0x1a0] sm:$0xff]  ;;  %v3111_v31 = vld [vmem:[#allocation5 + $0x1a8] sm:$0xff]  ;;  %v334_v43 = vld [vmem:[%s2938_s6 + $0x2b0] sm:$0xff] }
  0x7e   : > { %1387 = vxpose.xlu0.b32.cont [7/16] %v3033_v25, 128  ;;  %v328_v32 = vld [vmem:[%s2938_s6 + $0x280] sm:$0xff]  ;;  %v3123_v39 = vld [vmem:[#allocation5 + $0x1c8] sm:$0xff]  ;;  %v338_v53 = vld [vmem:[%s2938_s6 + $0x2d0] sm:$0xff] }
  0x7f   : > { %2336 = vmatpush1.bf16.msra.mxu0 %v2335_v61  ;;  %v314_v61 = vld [vmem:[%s2938_s6 + $0x210] sm:$0xff]  ;;  %v3119_v35 = vld [vmem:[#allocation5 + $0x1c0] sm:$0xff]  ;;  %v3135_v48 = vld [vmem:[#allocation5 + $0x1e8] sm:$0xff] }
  0x80   : > { %2338 = vmatprep.subr.bf16.mxu0 %v2337_v62  ;;  %v3073_v62 = vld [vmem:[#allocation5 + $0x140] sm:$0xff]  ;;  %v2367_v3 = vpack.c.bf16 %v314_v61, %v312_v59  ;;  %v3143_v54 = vld [vmem:[#allocation5 + $0x10] sm:$0xff]  ;;  %v3147_v59 = vld [vmem:[#allocation5 + $0x18] sm:$0xff] }
  0x81   : > { %1420 = vxpose.xlu1.b32.cont [8/16] %v3047_v36, 128  ;;  %v332_v40 = vld [vmem:[%s2938_s6 + $0x2a0] sm:$0xff]  ;;  %v346_v10 = vld [vmem:[%s2938_s6 + $0x310] sm:$0xff] }
  0x82   : > { %1388 = vxpose.xlu0.b32.cont [8/16] %v3043_v33, 128  ;;  %v3131_v44 = vld [vmem:[#allocation5 + $0x1e0] sm:$0xff]  ;;  %v3167_v11 = vld [vmem:[#allocation5 + $0x50] sm:$0xff] }
  0x83   : > { %2340 = vmatpush1.bf16.msra.mxu0 %v2339_v5  ;;  %v2369_v5 = vpack.c.bf16 %v319_v0, %v317_v63  ;;  %v336_v50 = vld [vmem:[%s2938_s6 + $0x2c0] sm:$0xff]  ;;  %v342_v63 = vld [vmem:[%s2938_s6 + $0x2f0] sm:$0xff] }
  0x84   : > { %2342 = vmatprep.subr.bf16.mxu0 %v2341_v6  ;;  %v316_v6 = vld [vmem:[%s2938_s6 + $0x220] sm:$0xff]  ;;  %v3155_v0 = vld [vmem:[#allocation5 + $0x30] sm:$0xff] }
  0x85   : > { %1421 = vxpose.xlu1.b32.cont [9/16] %v3057_v45, 128  ;;  %v340_v61 = vld [vmem:[%s2938_s6 + $0x2e0] sm:$0xff] }
  0x86   : > { %1389 = vxpose.xlu0.b32.cont [9/16] %v3053_v41, 128 }
  0x87   : > { %2344 = vmatpush1.bf16.msra.mxu0 %v2343_v13  ;;  %v3087_v13 = vld [vmem:[#allocation5 + $0x168] sm:$0xff] }
  0x88   : > { %2346 = vmatprep.subr.bf16.mxu0 %v2345_v14  ;;  %v2371_v14 = vpack.c.bf16 %v318_v7, %v316_v6  ;;  %v3159_v6 = vld [vmem:[#allocation5 + $0x38] sm:$0xff]  ;;  %v344_v7 = vld [vmem:[%s2938_s6 + $0x300] sm:$0xff] }
  0x89   : > { %1422 = vxpose.xlu1.b32.cont [10/16] %v3067_v55, 128 }
  0x8a   : > { %1390 = vxpose.xlu0.b32.cont [10/16] %v3063_v51, 128 }
  0x8b   : > { %2348 = vmatpush1.bf16.msra.mxu0 %v2347_v21  ;;  %v325_v21 = vld [vmem:[%s2938_s6 + $0x268] sm:$0xff] }
  0x8c   : > { %2350 = vmatprep.subr.bf16.mxu0 %v2349_v22  ;;  %v327_v22 = vld [vmem:[%s2938_s6 + $0x278] sm:$0xff] }
  0x8d   : > { %1423 = vxpose.xlu1.b32.cont [11/16] %v3077_v2, 128 }
  0x8e   : > { %1391 = vxpose.xlu0.b32.cont [11/16] %v3073_v62, 128 }
  0x8f   : > { %2352 = vmatpush1.bf16.msra.mxu0 %v2351_v29  ;;  %v329_v29 = vld [vmem:[%s2938_s6 + $0x288] sm:$0xff] }
  0x90   : > { %2354 = vmatprep.subr.bf16.mxu0 %v2353_v30  ;;  %v331_v30 = vld [vmem:[%s2938_s6 + $0x298] sm:$0xff] }
  0x91   : > { %1424 = vxpose.xlu1.b32.cont [12/16] %v3087_v13, 128 }
  0x92   : > { %1392 = vxpose.xlu0.b32.cont [12/16] %v3083_v8, 128 }
  0x93   : > { %2356 = vmatpush1.bf16.msra.mxu0 %v2355_v37  ;;  %v333_v37 = vld [vmem:[%s2938_s6 + $0x2a8] sm:$0xff] }
  0x94   : > { %2358 = vmatprep.subr.bf16.mxu0 %v2357_v38  ;;  %v335_v38 = vld [vmem:[%s2938_s6 + $0x2b8] sm:$0xff] }
  0x95   : > { %1425 = vxpose.xlu1.b32.cont [13/16] %v3099_v23, 128 }
  0x96   : > { %1393 = vxpose.xlu0.b32.cont [13/16] %v3095_v19, 128 }
  0x97   : > { %2360 = vmatpush1.bf16.msra.mxu0 %v2359_v46  ;;  %v337_v46 = vld [vmem:[%s2938_s6 + $0x2c8] sm:$0xff] }
  0x98   : > { %2362 = vmatprep.subr.bf16.mxu0 %v2361_v47  ;;  %v339_v47 = vld [vmem:[%s2938_s6 + $0x2d8] sm:$0xff] }
  0x99   : > { %1426 = vxpose.xlu1.b32.cont [14/16] %v3111_v31, 128 }
  0x9a   : > { %1394 = vxpose.xlu0.b32.cont [14/16] %v3107_v27, 128 }
  0x9b   : > { %2364 = vmatpush1.bf16.msra.mxu0 %v2363_v56  ;;  %v341_v56 = vld [vmem:[%s2938_s6 + $0x2e8] sm:$0xff] }
  0x9c   : > { %2366 = vmatprep.subr.bf16.mxu0 %v2365_v58  ;;  %v343_v58 = vld [vmem:[%s2938_s6 + $0x2f8] sm:$0xff] }
  0x9d   : > { %1427 = vxpose.xlu1.b32.cont [15/16] %v3123_v39, 128 }
  0x9e   : > { %505 = vmatmul.mubr.f32.vlgmr.msra.gmra.mrb[0].mxu0 %v2976_v42  ;;  %v2375_v42 = vpack.c.bf16 %v322_v18, %v320_v16  ;;  %1395 = vxpose.xlu0.b32.cont [15/16] %v3119_v35, 128  ;;  %v3171_v16 = vld [vmem:[#allocation5 + $0x58] sm:$0xff]  ;;  %v348_v18 = vld [vmem:[%s2938_s6 + $0x320] sm:$0xff] }
  0x9f   : > { %2368 = vmatpush1.bf16.msra.mxu0 %v2367_v3  ;;  %510 = vmatprep.mubr.f32.mxu0 %v2987_v52  ;;  %v2377_v52 = vpack.c.bf16 %v327_v22, %v325_v21  ;;  %v345_v3 = vld [vmem:[%s2938_s6 + $0x308] sm:$0xff]  ;;  %v350_v21 = vld [vmem:[%s2938_s6 + $0x330] sm:$0xff] }
  0xa0   : > { %2370 = vmatprep.subr.bf16.mxu0 %v2369_v5  ;;  %v347_v5 = vld [vmem:[%s2938_s6 + $0x318] sm:$0xff]  ;;  %v353_v22 = vld [vmem:[%s2938_s6 + $0x348] sm:$0xff] }
  0xa1   : > { %1428 = vxpose.xlu1.b32.end [16/16] %v3135_v48, 128 }
  0xa2   : > { %511 = vmatmul.mubr.f32.gmra.mrb[2].mxu0 %v2983_v49  ;;  %v2379_v49 = vpack.c.bf16 %v326_v26, %v324_v24  ;;  %1396 = vxpose.xlu0.b32.end [16/16] %v3131_v44, 128  ;;  %v354_v24 = vld [vmem:[%s2938_s6 + $0x350] sm:$0xff]  ;;  %v357_v26 = vld [vmem:[%s2938_s6 + $0x368] sm:$0xff] }
  0xa3   : > { %2372 = vmatpush1.bf16.msra.mxu0 %v2371_v14  ;;  %516 = vmatprep.mubr.f32.mxu0 %v2997_v60  ;;  %v2381_v60 = vpack.c.bf16 %v331_v30, %v329_v29  ;;  %v349_v14 = vld [vmem:[%s2938_s6 + $0x328] sm:$0xff]  ;;  %v359_v29 = vld [vmem:[%s2938_s6 + $0x378] sm:$0xff]  ;;  %v356_v30 = vld [vmem:[%s2938_s6 + $0x360] sm:$0xff] }
  0xa4   : > { %2374 = vmatprep.subr.bf16.mxu0 %v2373_v15  ;;  %v351_v15 = vld [vmem:[%s2938_s6 + $0x338] sm:$0xff] }
  0xa5   : > { %1477 = vxpose.xlu1.b32.start [1/16] %v3147_v59, 128 }
  0xa6   : > { %517 = vmatmul.mubr.f32.gmra.mrb[4].mxu0 %v2993_v57  ;;  %v2383_v57 = vpack.c.bf16 %v330_v34, %v328_v32  ;;  %1445 = vxpose.xlu0.b32.start [1/16] %v3143_v54, 128  ;;  %v363_v32 = vld [vmem:[%s2938_s6 + $0x398] sm:$0xff]  ;;  %v360_v34 = vld [vmem:[%s2938_s6 + $0x380] sm:$0xff] }
  0xa7   : > { %2376 = vmatpush1.bf16.msra.mxu0 %v2375_v42  ;;  %522 = vmatprep.mubr.f32.mxu0 %v3007_v4  ;;  %v2385_v4 = vpack.c.bf16 %v335_v38, %v333_v37  ;;  %v355_v42 = vld [vmem:[%s2938_s6 + $0x358] sm:$0xff]  ;;  %v362_v37 = vld [vmem:[%s2938_s6 + $0x390] sm:$0xff]  ;;  %v365_v38 = vld [vmem:[%s2938_s6 + $0x3a8] sm:$0xff] }
  0xa8   : > { %2378 = vmatprep.subr.bf16.mxu0 %v2377_v52  ;;  %v352_v52 = vld [vmem:[%s2938_s6 + $0x340] sm:$0xff] }
  0xa9   : > { %1478 = vxpose.xlu1.b32.cont [2/16] %v3159_v6, 128 }
  0xaa   : > { %523 = vmatmul.mubr.f32.gmra.mrb[6].mxu0 %v3003_v1  ;;  %v2387_v1 = vpack.c.bf16 %v334_v43, %v332_v40  ;;  %1446 = vxpose.xlu0.b32.cont [2/16] %v3155_v0, 128  ;;  %v366_v40 = vld [vmem:[%s2938_s6 + $0x3b0] sm:$0xff]  ;;  %v369_v43 = vld [vmem:[%s2938_s6 + $0x3c8] sm:$0xff] }
  0xab   : > { %2380 = vmatpush1.bf16.msra.mxu0 %v2379_v49  ;;  %528 = vmatprep.mubr.f32.mxu0 %v3017_v12  ;;  %v2389_v12 = vpack.c.bf16 %v339_v47, %v337_v46  ;;  %v358_v49 = vld [vmem:[%s2938_s6 + $0x370] sm:$0xff]  ;;  %v371_v46 = vld [vmem:[%s2938_s6 + $0x3d8] sm:$0xff] }
  0xac   : > { %2382 = vmatprep.subr.bf16.mxu0 %v2381_v60  ;;  %v361_v60 = vld [vmem:[%s2938_s6 + $0x388] sm:$0xff]  ;;  %v2421_v47 = vpack.c.bf16 %v371_v46, %v369_v43 }
  0xad   : > { %1479 = vxpose.xlu1.b32.cont [3/16] %v3171_v16, 128 }
  0xae   : > { %529 = vmatmul.mubr.f32.gmra.mrb[8].mxu0 %v3013_v9  ;;  %v2391_v9 = vpack.c.bf16 %v338_v53, %v336_v50  ;;  %1447 = vxpose.xlu0.b32.cont [3/16] %v3167_v11, 128  ;;  %v375_v50 = vld [vmem:[%s2938_s6 + $0x3f8] sm:$0xff] }
  0xaf   : > { %2384 = vmatpush1.bf16.msra.mxu0 %v2383_v57  ;;  %534 = vmatprep.mubr.f32.mxu0 %v3027_v20  ;;  %v2393_v20 = vpack.c.bf16 %v343_v58, %v341_v56  ;;  %v367_v57 = vld [vmem:[%s2938_s6 + $0x3b8] sm:$0xff]  ;;  %v372_v56 = vld [vmem:[%s2938_s6 + $0x3e0] sm:$0xff]  ;;  %v374_v58 = vld [vmem:[%s2938_s6 + $0x3f0] sm:$0xff] }
  0xb0   : > { %2386 = vmatprep.subr.bf16.mxu0 %v2385_v4  ;;  %v364_v4 = vld [vmem:[%s2938_s6 + $0x3a0] sm:$0xff] }
  0xb2   : > { %535 = vmatmul.mubr.f32.gmra.mrb[10].mxu0 %v3023_v17  ;;  %v2395_v17 = vpack.c.bf16 %v342_v63, %v340_v61 }
  0xb3   : > { %2388 = vmatpush1.bf16.msra.mxu0 %v2387_v1  ;;  %540 = vmatprep.mubr.f32.mxu0 %v3037_v28  ;;  %v2397_v28 = vpack.c.bf16 %v347_v5, %v345_v3  ;;  %v370_v1 = vld [vmem:[%s2938_s6 + $0x3d0] sm:$0xff] }
  0xb4   : > { %2390 = vmatprep.subr.bf16.mxu0 %v2389_v12  ;;  %v373_v12 = vld [vmem:[%s2938_s6 + $0x3e8] sm:$0xff] }
  0xb6   : > { %541 = vmatmul.mubr.f32.gmra.mrb[12].mxu0 %v3033_v25  ;;  %v2399_v25 = vpack.c.bf16 %v346_v10, %v344_v7 }
  0xb7   : > { %2392 = vmatpush1.bf16.msra.mxu0 %v2391_v9  ;;  %546 = vmatprep.mubr.f32.mxu0 %v3047_v36  ;;  %v2401_v36 = vpack.c.bf16 %v351_v15, %v349_v14 }
  0xb8   : > { %2394 = vmatprep.subr.bf16.mxu0 %v2393_v20 }
  0xba   : > { %547 = vmatmul.mubr.f32.gmra.mrb[14].mxu0 %v3043_v33  ;;  %v2403_v33 = vpack.c.bf16 %v350_v21, %v348_v18 }
  0xbb   : > { %2396 = vmatpush1.bf16.msra.mxu0 %v2395_v17  ;;  %552 = vmatprep.mubr.f32.mxu0 %v3057_v45  ;;  %v2405_v45 = vpack.c.bf16 %v355_v42, %v353_v22 }
  0xbc   : > { %2398 = vmatprep.subr.bf16.mxu0 %v2397_v28 }
  0xbe   : > { %553 = vmatmul.mubr.f32.gmra.mrb[16].mxu0 %v3053_v41  ;;  %v2407_v41 = vpack.c.bf16 %v354_v24, %v352_v52 }
  0xbf   : > { %2400 = vmatpush1.bf16.msra.mxu0 %v2399_v25  ;;  %558 = vmatprep.mubr.f32.mxu0 %v3067_v55  ;;  %v2409_v55 = vpack.c.bf16 %v359_v29, %v357_v26 }
  0xc0   : > { %2402 = vmatprep.subr.bf16.mxu0 %v2401_v36  ;;  %v762_v36 = vlaneseq }
  0xc2   : > { %559 = vmatmul.mubr.f32.gmra.mrb[18].mxu0 %v3063_v51  ;;  %v2411_v51 = vpack.c.bf16 %v358_v49, %v356_v30  ;;  %v763_v22 = vshrl.u32 %v762_v36, 7  ;;  %v395_v30 = vld [vmem:[#allocation5 + $0x98] sm:$0xff] }
  0xc3   : > { %2404 = vmatpush1.bf16.msra.mxu0 %v2403_v33  ;;  %564 = vmatprep.mubr.f32.mxu0 %v3077_v2  ;;  %v2413_v2 = vpack.c.bf16 %v363_v32, %v361_v60 }
  0xc4   : > { %2406 = vmatprep.subr.bf16.mxu0 %v2405_v45  ;;  %v765_v45 = vadd.s32 16, %v763_v22 }
  0xc6   : > { %565 = vmatmul.mubr.f32.gmra.mrb[20].mxu0 %v3073_v62  ;;  %v2415_v62 = vpack.c.bf16 %v362_v37, %v360_v34  ;;  %vm781_vm0 = vcmp.lt.s32.totalorder %v765_v45, 20  ;;  %v394_v37 = vld [vmem:[#allocation5 + $0x90] sm:$0xff] }
  0xc7   : > { %2408 = vmatpush1.bf16.msra.mxu0 %v2407_v41  ;;  %570 = vmatprep.mubr.f32.mxu0 %v3087_v13  ;;  %v2417_v13 = vpack.c.bf16 %v367_v57, %v365_v38  ;;  %v391_v41 = vld [vmem:[#allocation5 + $0x78] sm:$0xff] }
  0xc8   : > { %2410 = vmatprep.subr.bf16.mxu0 %v2409_v55  ;;  %v390_v55 = vld [vmem:[#allocation5 + $0x70] sm:$0xff]  ;;  %1480 = vxpose.xlu1.b32.cont [4/16] %v391_v41, 128 }
  0xc9   : > { %1448 = vxpose.xlu0.b32.cont [4/16] %v390_v55, 128 }
  0xca   : > { %571 = vmatmul.mubr.f32.gmra.mrb[22].mxu0 %v3083_v8  ;;  %v2419_v8 = vpack.c.bf16 %v366_v40, %v364_v4 }
  0xcb   : > { %2412 = vmatpush1.bf16.msra.mxu0 %v2411_v51  ;;  %576 = vmatprep.mubr.f32.mxu0 %v3099_v23  ;;  %v368_v23 = vld [vmem:[%s2938_s6 + $0x3c0] sm:$0xff] }
  0xcc   : > { %2414 = vmatprep.subr.bf16.mxu0 %v2413_v2  ;;  %v2423_v53 = vpack.c.bf16 %v370_v1, %v368_v23  ;;  %1481 = vxpose.xlu1.b32.cont [5/16] %v395_v30, 128 }
  0xcd   : > { %1449 = vxpose.xlu0.b32.cont [5/16] %v394_v37, 128 }
  0xce   : > { %577 = vmatmul.mubr.f32.gmra.mrb[24].mxu0 %v3095_v19  ;;  %v2425_v19 = vpack.c.bf16 %v375_v50, %v373_v12  ;;  %v403_v12 = vld [vmem:[#allocation5 + $0xd8] sm:$0xff] }
  0xcf   : > { %2416 = vmatpush1.bf16.msra.mxu0 %v2415_v62  ;;  %582 = vmatprep.mubr.f32.mxu0 %v3111_v31  ;;  %v2427_v31 = vpack.c.bf16 %v374_v58, %v372_v56  ;;  %v402_v58 = vld [vmem:[#allocation5 + $0xd0] sm:$0xff] }
  0xd0   : > { %2418 = vmatprep.subr.bf16.mxu0 %v2417_v13  ;;  %v399_v13 = vld [vmem:[#allocation5 + $0xb8] sm:$0xff] }
  0xd1   : > { %1482 = vxpose.xlu1.b32.cont [6/16] %v399_v13, 128 }
  0xd2   : > { %583 = vmatmul.mubr.f32.gmra.mrb[26].mxu0 %v3107_v27 }
  0xd3   : > { %2420 = vmatpush1.bf16.msra.mxu0 %v2419_v8  ;;  %588 = vmatprep.mubr.f32.mxu0 %v3123_v39 }
  0xd4   : > { %2422 = vmatprep.subr.bf16.mxu0 %v2421_v47  ;;  %v398_v47 = vld [vmem:[#allocation5 + $0xb0] sm:$0xff] }
  0xd5   : > { %1450 = vxpose.xlu0.b32.cont [6/16] %v398_v47, 128  ;;  %1483 = vxpose.xlu1.b32.cont [7/16] %v403_v12, 128 }
  0xd6   : > { %589 = vmatmul.mubr.f32.gmra.mrb[28].mxu0 %v3119_v35 }
  0xd7   : > { %2424 = vmatpush1.bf16.msra.mxu0 %v2423_v53  ;;  %594 = vmatprep.mubr.f32.mxu0 %v3135_v48 }
  0xd8   : > { %2426 = vmatprep.subr.bf16.mxu0 %v2425_v19 }
  0xd9   : > { %1451 = vxpose.xlu0.b32.cont [7/16] %v402_v58, 128 }
  0xda   : > { %595 = vmatmul.mubr.f32.gmra.mrb[30].mxu0 %v3131_v44 }
  0xdb   : > { %2428 = vmatpush1.bf16.msra.mxu0 %v2427_v31  ;;  %665 = vmatprep.mubr.f32.mxu0 %v3147_v59 }
  0xde   : > { %666 = vmatmul.mubr.f32.vlgmr.msra.gmra.mrb[0].mxu0 %v3143_v54 }
  0xdf   : > { %671 = vmatprep.mubr.f32.mxu0 %v3159_v6 }
  0xe2   : > { %672 = vmatmul.mubr.f32.gmra.mrb[2].mxu0 %v3155_v0 }
  0xe3   : > { %677 = vmatprep.mubr.f32.mxu0 %v3171_v16 }
  0xe6   : > { %678 = vmatmul.mubr.f32.gmra.mrb[4].mxu0 %v3167_v11 }
  0xe7   : > { %683 = vmatprep.mubr.f32.mxu0 %v391_v41 }
  0xea   : > { %684 = vmatmul.mubr.f32.gmra.mrb[32].mxu0 %v390_v55 }
  0xeb   : > { %689 = vmatprep.mubr.f32.mxu0 %v395_v30 }
  0xee   : > { %690 = vmatmul.mubr.f32.gmra.mrb[34].mxu0 %v394_v37 }
  0xef   : > { %695 = vmatprep.mubr.f32.mxu0 %v399_v13 }
  0xf2   : > { %696 = vmatmul.mubr.f32.gmra.mrb[36].mxu0 %v398_v47 }
  0xf3   : > { %701 = vmatprep.mubr.f32.mxu0 %v403_v12 }
  0xf6   : > { %702 = vmatmul.mubr.f32.gmra.mrb[38].mxu0 %v402_v58 }
 0x17d   : > { %v524_v27 = vpop.f32.mrb[6].mxu0 }
 0x17e   : > { %v526_v35 = vpop.f32.mrb[7].mxu0 }
 0x17f   : > { %v407_v35 = vld [vmem:[#allocation5 + $0xf8] sm:$0xff] }
 0x180   : > { %707 = vmatprep.mubr.f32.mxu0 %v407_v35  ;;  %1484 = vxpose.xlu1.b32.cont [8/16] %v407_v35, 128 }
 0x181   : > { %v530_v39 = vpop.f32.mrb[8].mxu0 }
 0x182   : > { %v532_v48 = vpop.f32.mrb[9].mxu0 }
 0x185   : > { %v536_v9 = vpop.f32.mrb[10].mxu0 }
 0x186   : > { %v538_v20 = vpop.f32.mrb[11].mxu0 }
 0x189   : > { %v542_v44 = vpop.f32.mrb[12].mxu0 }
 0x18a   : > { %v544_v61 = vpop.f32.mrb[13].mxu0  ;;  %v406_v44 = vld [vmem:[#allocation5 + $0xf0] sm:$0xff] }
 0x18b   : > { %1452 = vxpose.xlu0.b32.cont [8/16] %v406_v44, 128  ;;  %708 = vmatmul.mubr.f32.gmra.mrb[40].mxu0 %v406_v44  ;;  %v414_v44 = vld [vmem:[#allocation5 + $0x130] sm:$0xff] }
 0x18d   : > { %v548_v63 = vpop.f32.mrb[14].mxu0 }
 0x18e   : > { %v550_v59 = vpop.f32.mrb[15].mxu0 }
 0x18f   : > { %v411_v59 = vld [vmem:[#allocation5 + $0x118] sm:$0xff] }
 0x190   : > { %713 = vmatprep.mubr.f32.mxu0 %v411_v59  ;;  %1485 = vxpose.xlu1.b32.cont [9/16] %v411_v59, 128 }
 0x191   : > { %v554_v3 = vpop.f32.mrb[16].mxu0 }
 0x192   : > { %v556_v54 = vpop.f32.mrb[17].mxu0 }
 0x195   : > { %v560_v5 = vpop.f32.mrb[18].mxu0 }
 0x196   : > { %v562_v6 = vpop.f32.mrb[19].mxu0 }
 0x199   : > { %v566_v17 = vpop.f32.mrb[20].mxu0 }
 0x19a   : > { %v568_v0 = vpop.f32.mrb[21].mxu0  ;;  %v410_v17 = vld [vmem:[#allocation5 + $0x110] sm:$0xff] }
 0x19b   : > { %1453 = vxpose.xlu0.b32.cont [9/16] %v410_v17, 128  ;;  %714 = vmatmul.mubr.f32.gmra.mrb[42].mxu0 %v410_v17 }
 0x19d   : > { %v572_v28 = vpop.f32.mrb[22].mxu0 }
 0x19e   : > { %v574_v7 = vpop.f32.mrb[23].mxu0 }
 0x19f   : > { %1454 = vxpose.xlu0.b32.cont [10/16] %v414_v44, 128 }
 0x1a1   : > { %v578_v10 = vpop.f32.mrb[24].mxu0 }
 0x1a2   : > { %v580_v11 = vpop.f32.mrb[25].mxu0 }
 0x1a5   : > { %v584_v14 = vpop.f32.mrb[26].mxu0 }
 0x1a6   : > { %v586_v15 = vpop.f32.mrb[27].mxu0 }
 0x1a9   : > { %v590_v16 = vpop.f32.mrb[28].mxu0 }
 0x1aa   : > { %v592_v25 = vpop.f32.mrb[29].mxu0 }
 0x1ad   : > { %v596_v18 = vpop.f32.mrb[30].mxu0 }
 0x1ae   : > { %v598_v21 = vpop.f32.mrb[31].mxu0 }
 0x1b1   : > { %v3224_v42 = vpop.f32.mrb[0].mxu0 }
 0x1b2   : > { %v3226_v33 = vpop.f32.mrb[1].mxu0 }
 0x1b5   : > { %v3228_v52 = vpop.f32.mrb[2].mxu0 }
 0x1b6   : > { %v828_v24 = vmax.f32 %v3228_v52, -1e+30  ;;  %v3231_v26 = vpop.f32.mrb[3].mxu0 }
 0x1b7   : > { %v849_v29 = vmax.f32 %v3231_v26, -1e+30 }
 0x1b8   : > { %v830_v49 = vmax.f32 %v828_v24, -1e+30 }
 0x1b9   : > { %v851_v60 = vmax.f32 %v849_v29, -1e+30  ;;  %v679_v32 = vpop.f32.mrb[4].mxu0 }
 0x1ba   : > { %v832_v51 = vmax.f32 %v830_v49, -1e+30  ;;  %v3235_v2 = vsel %vm781_vm0, %v679_v32, -1e+30  ;;  %v681_v34 = vpop.f32.mrb[5].mxu0 }
 0x1bb   : > { %v853_v38 = vmax.f32 %v851_v60, -1e+30  ;;  %v827_v57 = vmax.f32 %v3224_v42, %v3235_v2  ;;  %v3240_v62 = vsel %vm781_vm0, %v681_v34, -1e+30 }
 0x1bc   : > { %v834_v4 = vmax.f32 %v832_v51, -1e+30  ;;  %v848_v40 = vmax.f32 %v3226_v33, %v3240_v62 }
 0x1bd   : > { %v855_v43 = vmax.f32 %v853_v38, -1e+30  ;;  %v829_v46 = vmax.f32 %v827_v57, -1e+30 }
 0x1be   : > { %v850_v8 = vmax.f32 %v848_v40, -1e+30  ;;  %v836_v23 = vmax.f32 %v834_v4, -1e+30 }
 0x1bf   : > { %v831_v1 = vmax.f32 %v829_v46, -1e+30  ;;  %v857_v50 = vmax.f32 %v855_v43, -1e+30 }
 0x1c0   : > { %v852_v53 = vmax.f32 %v850_v8, -1e+30  ;;  %v838_v31 = vmax.f32 %v836_v23, -1e+30 }
 0x1c1   : > { %v833_v19 = vmax.f32 %v831_v1, -1e+30  ;;  %v859_v39 = vmax.f32 %v857_v50, -1e+30 }
 0x1c2   : > { %v854_v56 = vmax.f32 %v852_v53, -1e+30  ;;  %v840_v61 = vmax.f32 %v838_v31, -1e+30 }
 0x1c3   : > { %v835_v27 = vmax.f32 %v833_v19, -1e+30  ;;  %v861_v3 = vmax.f32 %v859_v39, -1e+30 }
 0x1c4   : > { %v856_v48 = vmax.f32 %v854_v56, -1e+30 }
 0x1c5   : > { %v837_v9 = vmax.f32 %v835_v27, -1e+30 }
 0x1c6   : > { %v858_v20 = vmax.f32 %v856_v48, -1e+30 }
 0x1c7   : > { %v839_v63 = vmax.f32 %v837_v9, -1e+30 }
 0x1c8   : > { %v860_v54 = vmax.f32 %v858_v20, -1e+30  ;;  %v415_v20 = vld [vmem:[#allocation5 + $0x138] sm:$0xff] }
 0x1c9   : > { %v841_v5 = vmax.f32 %v839_v63, %v840_v61  ;;  %719 = vmatprep.mubr.f32.mxu0 %v415_v20  ;;  %1486 = vxpose.xlu1.b32.cont [10/16] %v415_v20, 128 }
 0x1ca   : > { %v862_v6 = vmax.f32 %v860_v54, %v861_v3  ;;  %720 = vmatmul.mubr.f32.gmra.mrb[44].mxu0 %v414_v44  ;;  %v419_v54 = vld [vmem:[#allocation5 + $0x158] sm:$0xff] }
 0x1cb   : > { %v842_v0 = vrot.slane %v841_v5, 4  ;;  %725 = vmatprep.mubr.f32.mxu0 %v419_v54 }
 0x1cc   : > { %v863_v28 = vrot.slane %v862_v6, 4 }
 0x1cd   : > { %v843_v7 = vmax.f32 %v841_v5, %v842_v0  ;;  %v418_v5 = vld [vmem:[#allocation5 + $0x150] sm:$0xff]  ;;  %1487 = vxpose.xlu1.b32.cont [11/16] %v419_v54, 128 }
 0x1ce   : > { %v864_v10 = vmax.f32 %v862_v6, %v863_v28  ;;  %1455 = vxpose.xlu0.b32.cont [11/16] %v418_v5, 128  ;;  %726 = vmatmul.mubr.f32.gmra.mrb[46].mxu0 %v418_v5 }
 0x1cf   : > { %v844_v11 = vrot.slane %v843_v7, 2 }
 0x1d0   : > { %v865_v14 = vrot.slane %v864_v10, 2 }
 0x1d1   : > { %v845_v15 = vmax.f32 %v843_v7, %v844_v11  ;;  %v423_v7 = vld [vmem:[#allocation5 + $0x178] sm:$0xff] }
 0x1d2   : > { %v866_v16 = vmax.f32 %v864_v10, %v865_v14  ;;  %v422_v10 = vld [vmem:[#allocation5 + $0x170] sm:$0xff]  ;;  %731 = vmatprep.mubr.f32.mxu0 %v423_v7  ;;  %1488 = vxpose.xlu1.b32.cont [12/16] %v423_v7, 128 }
 0x1d3   : > { %v846_v25 = vrot.slane %v845_v15, 1  ;;  %1456 = vxpose.xlu0.b32.cont [12/16] %v422_v10, 128  ;;  %732 = vmatmul.mubr.f32.gmra.mrb[48].mxu0 %v422_v10 }
 0x1d4   : > { %v867_v36 = vrot.slane %v866_v16, 1 }
 0x1d5   : > { %v847_v18 = vmax.f32 %v845_v15, %v846_v25  ;;  %v427_v25 = vld [vmem:[#allocation5 + $0x198] sm:$0xff] }
 0x1d6   : > { %v868_v21 = vmax.f32 %v866_v16, %v867_v36  ;;  %v426_v36 = vld [vmem:[#allocation5 + $0x190] sm:$0xff]  ;;  %737 = vmatprep.mubr.f32.mxu0 %v427_v25  ;;  %1489 = vxpose.xlu1.b32.cont [13/16] %v427_v25, 128 }
 0x1d7   : > { %v869_v22 = vsub.f32 %v3224_v42, %v847_v18  ;;  %v871_v45 = vsub.f32 %v3228_v52, %v847_v18  ;;  %v873_v24 = vsub.f32 %v3235_v2, %v847_v18  ;;  %v875_v29 = vsub.f32 -1e+30, %v847_v18  ;;  %1457 = vxpose.xlu0.b32.cont [13/16] %v426_v36, 128  ;;  %738 = vmatmul.mubr.f32.gmra.mrb[50].mxu0 %v426_v36 }
 0x1d8   : > { %v870_v41 = vsub.f32 %v3226_v33, %v868_v21  ;;  %v872_v55 = vsub.f32 %v3231_v26, %v868_v21  ;;  %v874_v30 = vsub.f32 %v3240_v62, %v868_v21  ;;  %v876_v37 = vsub.f32 -1e+30, %v868_v21 }
 0x1d9   : > { %v901_v49 = vmul.f32 1.442695, %v869_v22  ;;  %v905_v60 = vmul.f32 1.442695, %v871_v45  ;;  %v909_v32 = vmul.f32 1.442695, %v873_v24 }
 0x1da   : > { %v913_v51 = vmul.f32 1.442695, %v875_v29  ;;  %v903_v34 = vmul.f32 1.442695, %v870_v41  ;;  %v907_v42 = vmul.f32 1.442695, %v872_v55 }
 0x1db   : > { %2564 = vpow2.f32 %v901_v49  ;;  %v911_v52 = vmul.f32 1.442695, %v874_v30  ;;  %v915_v2 = vmul.f32 1.442695, %v876_v37  ;;  %v431_v24 = vld [vmem:[#allocation5 + $0x1b8] sm:$0xff]  ;;  %v430_v29 = vld [vmem:[#allocation5 + $0x1b0] sm:$0xff] }
 0x1dc   : > { %2566 = vpow2.f32 %v905_v60  ;;  %743 = vmatprep.mubr.f32.mxu0 %v431_v24  ;;  %1458 = vxpose.xlu0.b32.cont [14/16] %v430_v29, 128  ;;  %v435_v60 = vld [vmem:[#allocation5 + $0x1d8] sm:$0xff] }
 0x1dd   : > { %2568 = vpow2.f32 %v909_v32  ;;  %744 = vmatmul.mubr.f32.gmra.mrb[52].mxu0 %v430_v29  ;;  %1490 = vxpose.xlu1.b32.cont [14/16] %v431_v24, 128  ;;  %v434_v32 = vld [vmem:[#allocation5 + $0x1d0] sm:$0xff] }
 0x1de   : > { %2570 = vpow2.f32 %v913_v51  ;;  %749 = vmatprep.mubr.f32.mxu0 %v435_v60 }
 0x1df   : > { %2572 = vpow2.f32 %v903_v34 }
 0x1e0   : > { %2574 = vpow2.f32 %v907_v42  ;;  %1459 = vxpose.xlu0.b32.cont [15/16] %v434_v32, 128  ;;  %v439_v42 = vld [vmem:[#allocation5 + $0x1f8] sm:$0xff] }
 0x1e1   : > { %2576 = vpow2.f32 %v911_v52  ;;  %750 = vmatmul.mubr.f32.gmra.mrb[54].mxu0 %v434_v32  ;;  %1491 = vxpose.xlu1.b32.cont [15/16] %v435_v60, 128  ;;  %v438_v52 = vld [vmem:[#allocation5 + $0x1f0] sm:$0xff] }
 0x1e2   : > { %2578 = vpow2.f32 %v915_v2  ;;  %755 = vmatprep.mubr.f32.mxu0 %v439_v42 }
 0x1e4   : > { %1460 = vxpose.xlu0.b32.end [16/16] %v438_v52, 128 }
 0x1e5   : > { %v3250_v33 = vpop.eup %2564  ;;  %756 = vmatmul.mubr.f32.gmra.mrb[56].mxu0 %v438_v52  ;;  %1492 = vxpose.xlu1.b32.end [16/16] %v439_v42, 128 }
 0x1e6   : > { %v3252_v26 = vpop.eup %2566 }
 0x1e7   : > { %v3254_v38 = vpop.eup %2568  ;;  %v965_v57 = vadd.f32 %v3252_v26, %v3250_v33 }
 0x1e8   : > { %v3258_v62 = vpop.eup %2570 }
 0x1e9   : > { %v3260_v13 = vpop.eup %2572  ;;  %v966_v4 = vadd.f32 %v3254_v38, %v965_v57  ;;  %v2756_v57 = vmov 0.0  }
 0x1ea   : > { %v3263_v40 = vpop.eup %2574  ;;  %1645 = vmatprep.mubr.f32.mxu1 %v2756_v57  ;;  %1573 = vmatprep.mubr.f32.mxu0 %v2756_v57 }
 0x1eb   : > { %v967_v43 = vadd.f32 %v3258_v62, %v966_v4  ;;  %v986_v46 = vadd.f32 %v3263_v40, %v3260_v13  ;;  %v3268_v8 = vpop.eup %2576 }
 0x1ec   : > { %v3272_v1 = vpop.eup %2578 }
 0x1ed   : > { %v968_v47 = vadd.f32 %v3258_v62, %v967_v43  ;;  %v987_v23 = vadd.f32 %v3268_v8, %v986_v46 }
 0x1ef   : > { %v969_v12 = vadd.f32 %v3258_v62, %v968_v47  ;;  %v988_v50 = vadd.f32 %v3272_v1, %v987_v23 }
 0x1f1   : > { %v970_v53 = vadd.f32 %v3258_v62, %v969_v12  ;;  %v989_v19 = vadd.f32 %v3272_v1, %v988_v50 }
 0x1f3   : > { %v971_v56 = vadd.f32 %v3258_v62, %v970_v53  ;;  %v990_v58 = vadd.f32 %v3272_v1, %v989_v19 }
 0x1f5   : > { %v972_v31 = vadd.f32 %v3258_v62, %v971_v56  ;;  %v991_v27 = vadd.f32 %v3272_v1, %v990_v58 }
 0x1f7   : > { %v973_v35 = vadd.f32 %v3258_v62, %v972_v31  ;;  %v992_v39 = vadd.f32 %v3272_v1, %v991_v27 }
 0x1f9   : > { %v974_v48 = vadd.f32 %v3258_v62, %v973_v35  ;;  %v993_v9 = vadd.f32 %v3272_v1, %v992_v39 }
 0x1fb   : > { %v975_v61 = vadd.f32 %v3258_v62, %v974_v48  ;;  %v994_v63 = vadd.f32 %v3272_v1, %v993_v9 }
 0x1fd   : > { %v976_v59 = vadd.f32 %v3258_v62, %v975_v61  ;;  %v995_v3 = vadd.f32 %v3272_v1, %v994_v63 }
 0x1ff   : > { %v977_v6 = vadd.f32 %v3258_v62, %v976_v59  ;;  %v996_v17 = vadd.f32 %v3272_v1, %v995_v3 }
 0x201   : > { %v978_v0 = vadd.f32 %v3258_v62, %v977_v6  ;;  %v997_v28 = vadd.f32 %v3272_v1, %v996_v17 }
 0x203   : > { %v979_v11 = vadd.f32 %v3258_v62, %v978_v0  ;;  %v998_v14 = vadd.f32 %v3272_v1, %v997_v28 }
 0x205   : > { %v980_v15 = vrot.slane %v979_v11, 4  ;;  %v999_v16 = vadd.f32 %v3272_v1, %v998_v14 }
 0x207   : > { %v981_v18 = vadd.f32 %v980_v15, %v979_v11  ;;  %v1000_v21 = vadd.f32 %v3272_v1, %v999_v16 }
 0x209   : > { %v982_v22 = vrot.slane %v981_v18, 2  ;;  %v1001_v45 = vrot.slane %v1000_v21, 4 }
 0x20b   : > { %v983_v41 = vadd.f32 %v982_v22, %v981_v18  ;;  %v1002_v55 = vadd.f32 %v1001_v45, %v1000_v21 }
 0x20d   : > { %v984_v30 = vrot.slane %v983_v41, 1  ;;  %v1003_v49 = vrot.slane %v1002_v55, 2 }
 0x20f   : > { %v985_v51 = vadd.f32 %v984_v30, %v983_v41  ;;  %v1004_v34 = vadd.f32 %v1003_v49, %v1002_v55 }
 0x211   : > { %2580 = vrcp.f32 %v985_v51  ;;  %v1005_v37 = vrot.slane %v1004_v34, 1 }
 0x213   : > { %v1006_v2 = vadd.f32 %v1005_v37, %v1004_v34 }
 0x215   : > { %2582 = vrcp.f32 %v1006_v2 }
 0x21b   : > { %v2581_v4 = vpop.eup %2580 }
 0x21c   : > { %v3301_v43 = vmul.f32 %v2581_v4, %v3254_v38  ;;  %v3304_v46 = vmul.f32 %v2581_v4, %v3258_v62  ;;  %v1009_v47 = vmul.f32 %v2581_v4, %v3250_v33  ;;  %v3308_v23 = vmul.f32 %v2581_v4, %v3252_v26 }
 0x21e   : > { %v2266_v12 = vadd.f32 -0.0025, %v3301_v43  ;;  %v3312_v53 = vadd.f32 -0.0025, %v3304_v46  ;;  %v2262_v9 = vadd.f32 -0.0025, %v1009_v47 }
 0x21f   : > { %v2583_v50 = vpop.eup %2582  ;;  %v2264_v61 = vadd.f32 -0.0025, %v3308_v23 }
 0x220   : > { %v1141_v19 = vand.u32 2147483647, %v2266_v12  ;;  %v1014_v56 = vmul.f32 %v2583_v50, %v3268_v8  ;;  %v1016_v38 = vmul.f32 %v2583_v50, %v3272_v1  ;;  %v1010_v58 = vmul.f32 %v2583_v50, %v3260_v13 }
 0x221   : > { %v1012_v62 = vmul.f32 %v2583_v50, %v3263_v40  ;;  %v1143_v39 = vand.u32 2147483647, %v3312_v53  ;;  %v1137_v3 = vand.u32 2147483647, %v2262_v9  ;;  %v1139_v54 = vand.u32 2147483647, %v2264_v61 }
 0x222   : > { %v2267_v31 = vadd.f32 -0.0025, %v1014_v56  ;;  %v2269_v33 = vadd.f32 -0.0025, %v1016_v38  ;;  %v2263_v27 = vadd.f32 -0.0025, %v1010_v58 }
 0x223   : > { %v1173_v26 = vadd.f32 1e-12, %v1141_v19  ;;  %v2265_v35 = vadd.f32 -0.0025, %v1012_v62  ;;  %v1175_v59 = vadd.f32 1e-12, %v1143_v39 }
 0x224   : > { %v1142_v48 = vand.u32 2147483647, %v2267_v31  ;;  %v1144_v20 = vand.u32 2147483647, %v2269_v33  ;;  %v1138_v44 = vand.u32 2147483647, %v2263_v27 }
 0x225   : > { %v1140_v63 = vand.u32 2147483647, %v2265_v35  ;;  %2584 = vrcp.f32 %v1173_v26  ;;  %v1169_v5 = vadd.f32 1e-12, %v1137_v3  ;;  %v1171_v6 = vadd.f32 1e-12, %v1139_v54 }
 0x226   : > { %v1174_v8 = vadd.f32 1e-12, %v1142_v48  ;;  %v1176_v1 = vadd.f32 1e-12, %v1144_v20  ;;  %v1170_v13 = vadd.f32 1e-12, %v1138_v44  ;;  %v3348_v44 = vpop.trf.xlu0 }
 0x227   : > { %v1172_v40 = vadd.f32 1e-12, %v1140_v63  ;;  %v1074_v17 = vmax.f32 %v2263_v27, 0.0  ;;  %v1078_v0 = vmax.f32 %v2267_v31, 0.0  ;;  %v1076_v28 = vmax.f32 %v2265_v35, 0.0 }
 0x228   : > { %2586 = vrcp.f32 %v1174_v8  ;;  %v1080_v11 = vmax.f32 %v2269_v33, 0.0  ;;  %v1073_v14 = vmax.f32 %v2262_v9, 0.0  ;;  %v1077_v16 = vmax.f32 %v2266_v12, 0.0 }
 0x229   : > { %2588 = vrcp.f32 %v1176_v1  ;;  %v1106_v25 = vmul.f32 %v1074_v17, %v1010_v58  ;;  %v1075_v36 = vmax.f32 %v2264_v61, 0.0  ;;  %v1110_v21 = vmul.f32 %v1078_v0, %v1014_v56 }
 0x22a   : > { %2590 = vrcp.f32 %v1170_v13  ;;  %v1108_v22 = vmul.f32 %v1076_v28, %v1012_v62  ;;  %v1079_v24 = vmax.f32 %v3312_v53, 0.0  ;;  %v1112_v55 = vmul.f32 %v1080_v11, %v1016_v38 }
 0x22b   : > { %2592 = vrcp.f32 %v1172_v40  ;;  %v1105_v60 = vmul.f32 %v1073_v14, %v1009_v47  ;;  %v1109_v51 = vmul.f32 %v1077_v16, %v3301_v43  ;;  %v1107_v37 = vmul.f32 %v1075_v36, %v3308_v23  ;;  %v3350_v40 = vpop.trf.xlu0 }
 0x22c   : > { %2594 = vrcp.f32 %v1175_v59  ;;  %v1111_v12 = vmul.f32 %v1079_v24, %v3304_v46 }
 0x22d   : > { %2596 = vrcp.f32 %v1169_v5 }
 0x22e   : > { %2598 = vrcp.f32 %v1171_v6 }
 0x22f   : > { %v2585_v7 = vpop.eup %2584  ;;  %v3352_v28 = vpop.trf.xlu0 }
 0x230   : > { %v3336_v50 = vmul.f32 %v2585_v7, %v1109_v51 }
 0x232   : > { %v2587_v10 = vpop.eup %2586  ;;  %v1269_v62 = vand.u32 2147483647, %v3336_v50 }
 0x233   : > { %v2589_v15 = vpop.eup %2588  ;;  %v3323_v30 = vmul.f32 %v2587_v10, %v1110_v21 }
 0x234   : > { %v2591_v18 = vpop.eup %2590  ;;  %v3330_v52 = vmul.f32 %v2589_v15, %v1112_v55 }
 0x235   : > { %v2593_v45 = vpop.eup %2592  ;;  %v3321_v29 = vmul.f32 %v2591_v18, %v1106_v25  ;;  %v1270_v47 = vand.u32 2147483647, %v3323_v30  ;;  %v3354_v25 = vpop.trf.xlu0 }
 0x236   : > { %v2595_v41 = vpop.eup %2594  ;;  %v3325_v49 = vmul.f32 %v2593_v45, %v1108_v22  ;;  %v1272_v38 = vand.u32 2147483647, %v3330_v52 }
 0x237   : > { %v2597_v32 = vpop.eup %2596  ;;  %v1266_v34 = vand.u32 2147483647, %v3321_v29  ;;  %v3342_v56 = vmul.f32 %v2595_v41, %v1111_v12 }
 0x238   : > { %v2599_v42 = vpop.eup %2598  ;;  %v1268_v2 = vand.u32 2147483647, %v3325_v49  ;;  %v3333_v4 = vmul.f32 %v2597_v32, %v1105_v60 }
 0x239   : > { %v3338_v53 = vmul.f32 %v2599_v42, %v1107_v37  ;;  %v1271_v33 = vand.u32 2147483647, %v3342_v56  ;;  %v3356_v41 = vpop.trf.xlu0 }
 0x23a   : > { %v1318_v43 = vadd.f32 %v1268_v2, %v1266_v34  ;;  %v1265_v19 = vand.u32 2147483647, %v3333_v4 }
 0x23b   : > { %v1267_v23 = vand.u32 2147483647, %v3338_v53 }
 0x23c   : > { %v1319_v58 = vadd.f32 %v1318_v43, %v1270_v47 }
 0x23d   : > { %v1297_v31 = vadd.f32 %v1267_v23, %v1265_v19  ;;  %v3359_v2 = vpop.trf.xlu0 }
 0x23e   : > { %v1320_v46 = vadd.f32 %v1319_v58, %v1272_v38 }
 0x23f   : > { %v1298_v27 = vadd.f32 %v1297_v31, %v1269_v62 }
 0x240   : > { %v1321_v26 = vadd.f32 %v1320_v46, %v1272_v38 }
 0x241   : > { %v1299_v35 = vadd.f32 %v1298_v27, %v1271_v33  ;;  %v3362_v43 = vpop.trf.xlu0 }
 0x242   : > { %v1322_v39 = vadd.f32 %v1321_v26, %v1272_v38 }
 0x243   : > { %v1300_v48 = vadd.f32 %v1299_v35, %v1271_v33 }
 0x244   : > { %v1323_v9 = vadd.f32 %v1322_v39, %v1272_v38 }
 0x245   : > { %v1301_v20 = vadd.f32 %v1300_v48, %v1271_v33  ;;  %v3367_v23 = vpop.trf.xlu0  ;;  %v1429_v48 = vpop.trf.xlu1 }
 0x246   : > { %v1324_v61 = vadd.f32 %v1323_v9, %v1272_v38 }
 0x247   : > { %v1302_v8 = vadd.f32 %v1301_v20, %v1271_v33  ;;  %v685_v20 = vpop.f32.mrb[32].mxu0 }
 0x248   : > { %v1325_v63 = vadd.f32 %v1324_v61, %v1272_v38 }
 0x249   : > { %v1303_v1 = vadd.f32 %v1302_v8, %v1271_v33  ;;  %v1430_v61 = vpop.trf.xlu1  ;;  %v687_v8 = vpop.f32.mrb[33].mxu0 }
 0x24a   : > { %v1326_v13 = vadd.f32 %v1325_v63, %v1272_v38 }
 0x24b   : > { %v1304_v59 = vadd.f32 %v1303_v1, %v1271_v33  ;;  %v691_v1 = vpop.f32.mrb[34].mxu0 }
 0x24c   : > { %v1327_v3 = vadd.f32 %v1326_v13, %v1272_v38  ;;  %v693_v13 = vpop.f32.mrb[35].mxu0 }
 0x24d   : > { %v1305_v54 = vadd.f32 %v1304_v59, %v1271_v33  ;;  %v1431_v59 = vpop.trf.xlu1 }
 0x24e   : > { %v1328_v5 = vadd.f32 %v1327_v3, %v1272_v38  ;;  %v697_v3 = vpop.f32.mrb[36].mxu0 }
 0x24f   : > { %v1306_v6 = vadd.f32 %v1305_v54, %v1271_v33 }
 0x250   : > { %v1329_v17 = vadd.f32 %v1328_v5, %v1272_v38  ;;  %v699_v5 = vpop.f32.mrb[37].mxu0 }
 0x251   : > { %v1307_v0 = vadd.f32 %v1306_v6, %v1271_v33  ;;  %v703_v6 = vpop.f32.mrb[38].mxu0 }
 0x252   : > { %v1330_v7 = vadd.f32 %v1329_v17, %v1272_v38  ;;  %v1432_v17 = vpop.trf.xlu1 }
 0x253   : > { %v1308_v10 = vadd.f32 %v1307_v0, %v1271_v33  ;;  %v705_v0 = vpop.f32.mrb[39].mxu0 }
 0x254   : > { %v1331_v11 = vadd.f32 %v1330_v7, %v1272_v38 }
 0x255   : > { %v1309_v14 = vadd.f32 %v1308_v10, %v1271_v33 }
 0x256   : > { %v1332_v15 = vadd.f32 %v1331_v11, %v1272_v38 }
 0x257   : > { %v1310_v16 = vadd.f32 %v1309_v14, %v1271_v33  ;;  %v1433_v14 = vpop.trf.xlu1 }
 0x258   : > { %v1333_v36 = vrot.slane %v1332_v15, 4 }
 0x259   : > { %v1311_v18 = vadd.f32 %v1310_v16, %v1271_v33 }
 0x25a   : > { %v1334_v21 = vadd.f32 %v1333_v36, %v1332_v15 }
 0x25b   : > { %v1312_v22 = vrot.slane %v1311_v18, 4 }
 0x25c   : > { %v1335_v45 = vrot.slane %v1334_v21, 2 }
 0x25d   : > { %v1313_v24 = vadd.f32 %v1312_v22, %v1311_v18 }
 0x25e   : > { %v1336_v55 = vadd.f32 %v1335_v45, %v1334_v21  ;;  %v709_v10 = vpop.f32.mrb[40].mxu0 }
 0x25f   : > { %v1314_v60 = vrot.slane %v1313_v24, 2  ;;  %v711_v11 = vpop.f32.mrb[41].mxu0 }
 0x260   : > { %v1337_v32 = vrot.slane %v1336_v55, 1 }
 0x261   : > { %v1315_v51 = vadd.f32 %v1314_v60, %v1313_v24 }
 0x262   : > { %v1338_v34 = vadd.f32 %v1337_v32, %v1336_v55 }
 0x263   : > { %v1316_v37 = vrot.slane %v1315_v51, 1 }
 0x264   : > { %v1340_v42 = vmax.f32 %v1338_v34, 1e-12 }
 0x265   : > { %v1317_v12 = vadd.f32 %v1316_v37, %v1315_v51 }
 0x266   : > { %2600 = vrcp.f32 %v1340_v42 }
 0x267   : > { %v1339_v47 = vmax.f32 %v1317_v12, 1e-12 }
 0x269   : > { %2602 = vrcp.f32 %v1339_v47 }
 0x270   : > { %v2601_v19 = vpop.eup %2600 }
 0x271   : > { %v1344_v38 = vmul.f32 %v2601_v19, %v3321_v29  ;;  %v1346_v58 = vmul.f32 %v2601_v19, %v3325_v49  ;;  %v1348_v62 = vmul.f32 %v2601_v19, %v3323_v30  ;;  %v1350_v31 = vmul.f32 %v2601_v19, %v3330_v52  ;;  %v3377_v52 = vpop.trf.xlu0 }
 0x273   : > { %v2603_v46 = vpop.eup %2602  ;;  %1376 = vst [vmem:[%s246_s10 + $0x8] sm:$0xff] %v1344_v38  ;;  %1378 = vst [vmem:[%s246_s10 + $0x18] sm:$0xff] %v1346_v58  ;;  %v2429_v33 = vpack.c.bf16 %v1346_v58, %v1344_v38  ;;  %v2433_v27 = vpack.c.bf16 %v1350_v31, %v1348_v62 }
 0x274   : > { %1380 = vst [vmem:[%s246_s10 + $0x28] sm:$0xf] %v1348_v62  ;;  %v1343_v26 = vmul.f32 %v2603_v46, %v3333_v4  ;;  %v1345_v35 = vmul.f32 %v2603_v46, %v3338_v53  ;;  %v1347_v39 = vmul.f32 %v2603_v46, %v3336_v50  ;;  %v1349_v29 = vmul.f32 %v2603_v46, %v3342_v56 }
 0x275   : > { %2430 = vmatprep.subr.bf16.mxu0 %v2429_v33  ;;  %2461 = vmatprep.subr.bf16.mxu1 %v2429_v33  ;;  %v2437_v4 = vpack.c.bf16 %v1350_v31, %v1350_v31  ;;  %v3379_v53 = vpop.trf.xlu0 }
 0x276   : > { %1375 = vst [vmem:[%s246_s10] sm:$0xff] %v1343_v26  ;;  %1377 = vst [vmem:[%s246_s10 + $0x10] sm:$0xff] %v1345_v35  ;;  %v2431_v30 = vpack.c.bf16 %v1345_v35, %v1343_v26  ;;  %v2435_v49 = vpack.c.bf16 %v1349_v29, %v1347_v39  ;;  %v2439_v50 = vpack.c.bf16 %v1349_v29, %v1349_v29 }
 0x277   : > { %1379 = vst [vmem:[%s246_s10 + $0x20] sm:$0xf] %v1347_v39 }
 0x278   : > { %2432 = vmatpush1.bf16.msra.mxu0 %v2431_v30  ;;  %2469 = vmatpush1.bf16.msra.mxu1 %v2431_v30 }
 0x279   : > { %2434 = vmatprep.subr.bf16.mxu0 %v2433_v27  ;;  %2462 = vmatprep.subr.bf16.mxu1 %v2433_v27  ;;  %v3381_v56 = vpop.trf.xlu0 }
 0x27c   : > { %2436 = vmatpush1.bf16.msra.mxu0 %v2435_v49  ;;  %2470 = vmatpush1.bf16.msra.mxu1 %v2435_v49 }
 0x27d   : > { %2438 = vmatprep.subr.bf16.mxu0 %v2437_v4  ;;  %2463 = vmatprep.subr.bf16.mxu1 %v2437_v4  ;;  %v3383_v9 = vpop.trf.xlu0 }
 0x280   : > { %2440 = vmatpush1.bf16.msra.mxu0 %v2439_v50  ;;  %2471 = vmatpush1.bf16.msra.mxu1 %v2439_v50 }
 0x281   : > { %2442 = vmatprep.subr.bf16.mxu0 %v2437_v4  ;;  %2464 = vmatprep.subr.bf16.mxu1 %v2437_v4  ;;  %v1409_v63 = vpop.trf.xlu0 }
 0x284   : > { %2444 = vmatpush1.bf16.msra.mxu0 %v2439_v50  ;;  %2472 = vmatpush1.bf16.msra.mxu1 %v2439_v50 }
 0x285   : > { %2446 = vmatprep.subr.bf16.mxu0 %v2437_v4  ;;  %2465 = vmatprep.subr.bf16.mxu1 %v2437_v4  ;;  %v1410_v54 = vpop.trf.xlu0 }
 0x288   : > { %2448 = vmatpush1.bf16.msra.mxu0 %v2439_v50  ;;  %2473 = vmatpush1.bf16.msra.mxu1 %v2439_v50 }
 0x289   : > { %2450 = vmatprep.subr.bf16.mxu0 %v2437_v4  ;;  %2466 = vmatprep.subr.bf16.mxu1 %v2437_v4  ;;  %v1411_v7 = vpop.trf.xlu0 }
 0x28c   : > { %2452 = vmatpush1.bf16.msra.mxu0 %v2439_v50  ;;  %2474 = vmatpush1.bf16.msra.mxu1 %v2439_v50 }
 0x28d   : > { %2454 = vmatprep.subr.bf16.mxu0 %v2437_v4  ;;  %2467 = vmatprep.subr.bf16.mxu1 %v2437_v4  ;;  %v1412_v15 = vpop.trf.xlu0 }
 0x290   : > { %2456 = vmatpush1.bf16.msra.mxu0 %v2439_v50  ;;  %2475 = vmatpush1.bf16.msra.mxu1 %v2439_v50 }
 0x291   : > { %2458 = vmatprep.subr.bf16.mxu0 %v2437_v4  ;;  %2468 = vmatprep.subr.bf16.mxu1 %v2437_v4  ;;  %v1461_v22 = vpop.trf.xlu0 }
 0x294   : > { %2460 = vmatpush1.bf16.msra.mxu0 %v2439_v50  ;;  %2476 = vmatpush1.bf16.msra.mxu1 %v2439_v50 }
 0x295   : > { %v1462_v24 = vpop.trf.xlu0 }
 0x297   : > { %1574 = vmatmul.mubr.f32.vlgmr.msra.gmra.mrb[58].mxu0 %v3348_v44  ;;  %1646 = vmatmul.mubr.f32.vlgmr.msra.gmra.mrb[0].mxu1 %v1409_v63  ;;  %v715_v44 = vpop.f32.mrb[42].mxu0 }
 0x298   : > { %1579 = vmatprep.mubr.f32.mxu0 %v2756_v57  ;;  %1651 = vmatprep.mubr.f32.mxu1 %v2756_v57  ;;  %v717_v16 = vpop.f32.mrb[43].mxu0 }
 0x299   : > { %v1463_v32 = vpop.trf.xlu0 }
 0x29b   : > { %1580 = vmatmul.mubr.f32.gmra.mrb[60].mxu0 %v3350_v40  ;;  %1652 = vmatmul.mubr.f32.gmra.mrb[2].mxu1 %v1410_v54  ;;  %v1434_v40 = vpop.trf.xlu1 }
 0x29c   : > { %1585 = vmatprep.mubr.f32.mxu0 %v2756_v57  ;;  %1657 = vmatprep.mubr.f32.mxu1 %v2756_v57 }
 0x29d   : > { %v721_v55 = vpop.f32.mrb[44].mxu0  ;;  %v1464_v12 = vpop.trf.xlu0 }
 0x29e   : > { %v723_v60 = vpop.f32.mrb[45].mxu0 }
 0x29f   : > { %1586 = vmatmul.mubr.f32.gmra.mrb[62].mxu0 %v3352_v28  ;;  %1658 = vmatmul.mubr.f32.gmra.mrb[4].mxu1 %v1411_v7  ;;  %v1435_v28 = vpop.trf.xlu1 }
 0x2a0   : > { %1591 = vmatprep.mubr.f32.mxu0 %v2756_v57  ;;  %1663 = vmatprep.mubr.f32.mxu1 %v2756_v57 }
 0x2a1   : > { %v727_v51 = vpop.f32.mrb[46].mxu0 }
 0x2a2   : > { %v729_v34 = vpop.f32.mrb[47].mxu0 }
 0x2a3   : > { %1592 = vmatmul.mubr.f32.gmra.mrb[64].mxu0 %v3354_v25  ;;  %1664 = vmatmul.mubr.f32.gmra.mrb[6].mxu1 %v1412_v15  ;;  %v1436_v25 = vpop.trf.xlu1 }
 0x2a4   : > { %1597 = vmatprep.mubr.f32.mxu0 %v2756_v57  ;;  %1669 = vmatprep.mubr.f32.mxu1 %v2756_v57 }
 0x2a6   : > { %v733_v42 = vpop.f32.mrb[48].mxu0 }
 0x2a7   : > { %1598 = vmatmul.mubr.f32.gmra.mrb[66].mxu0 %v3356_v41  ;;  %1670 = vmatmul.mubr.f32.gmra.mrb[8].mxu1 %v1429_v48  ;;  %v1437_v36 = vpop.trf.xlu1 }
 0x2a8   : > { %1603 = vmatprep.mubr.f32.mxu0 %v2756_v57  ;;  %1675 = vmatprep.mubr.f32.mxu1 %v2756_v57 }
 0x2ab   : > { %1604 = vmatmul.mubr.f32.gmra.mrb[68].mxu0 %v3359_v2  ;;  %1676 = vmatmul.mubr.f32.gmra.mrb[10].mxu1 %v1430_v61  ;;  %v1438_v18 = vpop.trf.xlu1  ;;  %v735_v2 = vpop.f32.mrb[49].mxu0 }
 0x2ac   : > { %1609 = vmatprep.mubr.f32.mxu0 %v2756_v57  ;;  %1681 = vmatprep.mubr.f32.mxu1 %v2756_v57 }
 0x2af   : > { %1610 = vmatmul.mubr.f32.gmra.mrb[70].mxu0 %v3362_v43  ;;  %1682 = vmatmul.mubr.f32.gmra.mrb[12].mxu1 %v1431_v59  ;;  %v1439_v21 = vpop.trf.xlu1  ;;  %v739_v43 = vpop.f32.mrb[50].mxu0 }
 0x2b0   : > { %1615 = vmatprep.mubr.f32.mxu0 %v2756_v57  ;;  %1687 = vmatprep.mubr.f32.mxu1 %v2756_v57  ;;  %v741_v19 = vpop.f32.mrb[51].mxu0 }
 0x2b1   : > { %v745_v38 = vpop.f32.mrb[52].mxu0 }
 0x2b2   : > { %v747_v58 = vpop.f32.mrb[53].mxu0 }
 0x2b3   : > { %1616 = vmatmul.mubr.f32.gmra.mrb[72].mxu0 %v3367_v23  ;;  %1688 = vmatmul.mubr.f32.gmra.mrb[14].mxu1 %v1432_v17  ;;  %v1440_v45 = vpop.trf.xlu1  ;;  %v1465_v23 = vpop.trf.xlu0 }
 0x2b4   : > { %1621 = vmatprep.mubr.f32.mxu0 %v2756_v57  ;;  %1693 = vmatprep.mubr.f32.mxu1 %v2756_v57  ;;  %v751_v31 = vpop.f32.mrb[54].mxu0 }
 0x2b5   : > { %v753_v46 = vpop.f32.mrb[55].mxu0 }
 0x2b7   : > { %1622 = vmatmul.mubr.f32.gmra.mrb[74].mxu0 %v3377_v52  ;;  %1694 = vmatmul.mubr.f32.gmra.mrb[16].mxu1 %v1433_v14  ;;  %v1441_v41 = vpop.trf.xlu1  ;;  %v1466_v33 = vpop.trf.xlu0 }
 0x2b8   : > { %1627 = vmatprep.mubr.f32.mxu0 %v2756_v57  ;;  %1699 = vmatprep.mubr.f32.mxu1 %v2756_v57  ;;  %v757_v27 = vpop.f32.mrb[56].mxu0 }
 0x2b9   : > { %v759_v26 = vpop.f32.mrb[57].mxu0 }
 0x2bb   : > { %1628 = vmatmul.mubr.f32.gmra.mrb[76].mxu0 %v3379_v53  ;;  %1700 = vmatmul.mubr.f32.gmra.mrb[18].mxu1 %v1434_v40  ;;  %v1442_v37 = vpop.trf.xlu1  ;;  %v1467_v35 = vpop.trf.xlu0 }
 0x2bc   : > { %1633 = vmatprep.mubr.f32.mxu0 %v2756_v57  ;;  %1705 = vmatprep.mubr.f32.mxu1 %v2756_v57 }
 0x2bf   : > { %1634 = vmatmul.mubr.f32.gmra.mrb[78].mxu0 %v3381_v56  ;;  %1706 = vmatmul.mubr.f32.gmra.mrb[20].mxu1 %v1435_v28  ;;  %v1443_v47 = vpop.trf.xlu1  ;;  %v1468_v39 = vpop.trf.xlu0 }
 0x2c0   : > { %1639 = vmatprep.mubr.f32.mxu0 %v2756_v57  ;;  %1711 = vmatprep.mubr.f32.mxu1 %v2756_v57 }
 0x2c3   : > { %1640 = vmatmul.mubr.f32.gmra.mrb[80].mxu0 %v3383_v9  ;;  %1712 = vmatmul.mubr.f32.gmra.mrb[22].mxu1 %v1436_v25  ;;  %v1444_v62 = vpop.trf.xlu1  ;;  %v1469_v29 = vpop.trf.xlu0 }
 0x2c4   : > { %1717 = vmatprep.mubr.f32.mxu1 %v2756_v57 }
 0x2c7   : > { %1718 = vmatmul.mubr.f32.gmra.mrb[24].mxu1 %v1437_v36  ;;  %v1470_v30 = vpop.trf.xlu0  ;;  %v1493_v52 = vpop.trf.xlu1 }
 0x2c8   : > { %1723 = vmatprep.mubr.f32.mxu1 %v2756_v57 }
 0x2cb   : > { %1724 = vmatmul.mubr.f32.gmra.mrb[26].mxu1 %v1438_v18  ;;  %v1471_v49 = vpop.trf.xlu0  ;;  %v1494_v53 = vpop.trf.xlu1 }
 0x2cc   : > { %1729 = vmatprep.mubr.f32.mxu1 %v2756_v57 }
 0x2cf   : > { %1730 = vmatmul.mubr.f32.gmra.mrb[28].mxu1 %v1439_v21  ;;  %v1472_v4 = vpop.trf.xlu0  ;;  %v1495_v56 = vpop.trf.xlu1 }
 0x2d0   : > { %1735 = vmatprep.mubr.f32.mxu1 %v2756_v57 }
 0x2d3   : > { %1736 = vmatmul.mubr.f32.gmra.mrb[30].mxu1 %v1440_v45  ;;  %v1473_v50 = vpop.trf.xlu0  ;;  %v1496_v9 = vpop.trf.xlu1 }
 0x2d4   : > { %1741 = vmatprep.mubr.f32.mxu1 %v2756_v57 }
 0x2d7   : > { %1742 = vmatmul.mubr.f32.gmra.mrb[32].mxu1 %v1441_v41  ;;  %v1474_v48 = vpop.trf.xlu0  ;;  %v1497_v61 = vpop.trf.xlu1 }
 0x2d8   : > { %1747 = vmatprep.mubr.f32.mxu1 %v2756_v57 }
 0x2db   : > { %1748 = vmatmul.mubr.f32.gmra.mrb[34].mxu1 %v1442_v37  ;;  %v1475_v20 = vpop.trf.xlu0  ;;  %v1498_v63 = vpop.trf.xlu1 }
 0x2dc   : > { %1753 = vmatprep.mubr.f32.mxu1 %v2756_v57 }
 0x2df   : > { %1754 = vmatmul.mubr.f32.gmra.mrb[36].mxu1 %v1443_v47  ;;  %v1476_v8 = vpop.trf.xlu0  ;;  %v1499_v1 = vpop.trf.xlu1 }
 0x2e0   : > { %1759 = vmatprep.mubr.f32.mxu1 %v2756_v57 }
 0x2e3   : > { %1760 = vmatmul.mubr.f32.gmra.mrb[38].mxu1 %v1444_v62  ;;  %v1500_v13 = vpop.trf.xlu1 }
 0x2e4   : > { %1765 = vmatprep.mubr.f32.mxu1 %v2756_v57 }
 0x2e7   : > { %1766 = vmatmul.mubr.f32.gmra.mrb[40].mxu1 %v1461_v22  ;;  %v1501_v59 = vpop.trf.xlu1 }
 0x2e8   : > { %1771 = vmatprep.mubr.f32.mxu1 %v2756_v57 }
 0x2eb   : > { %1772 = vmatmul.mubr.f32.gmra.mrb[42].mxu1 %v1462_v24  ;;  %v1502_v3 = vpop.trf.xlu1 }
 0x2ec   : > { %1777 = vmatprep.mubr.f32.mxu1 %v2756_v57 }
 0x2ef   : > { %1778 = vmatmul.mubr.f32.gmra.mrb[44].mxu1 %v1463_v32  ;;  %v1503_v54 = vpop.trf.xlu1 }
 0x2f0   : > { %1783 = vmatprep.mubr.f32.mxu1 %v2756_v57 }
 0x2f3   : > { %1784 = vmatmul.mubr.f32.gmra.mrb[46].mxu1 %v1464_v12  ;;  %v1504_v5 = vpop.trf.xlu1 }
 0x2f4   : > { %1789 = vmatprep.mubr.f32.mxu1 %v2756_v57 }
 0x2f7   : > { %1790 = vmatmul.mubr.f32.gmra.mrb[48].mxu1 %v1465_v23  ;;  %v1505_v6 = vpop.trf.xlu1 }
 0x2f8   : > { %1795 = vmatprep.mubr.f32.mxu1 %v2756_v57 }
 0x2fb   : > { %1796 = vmatmul.mubr.f32.gmra.mrb[50].mxu1 %v1466_v33  ;;  %v1506_v17 = vpop.trf.xlu1 }
 0x2fc   : > { %1801 = vmatprep.mubr.f32.mxu1 %v2756_v57 }
 0x2ff   : > { %1802 = vmatmul.mubr.f32.gmra.mrb[52].mxu1 %v1467_v35  ;;  %v1507_v0 = vpop.trf.xlu1 }
 0x300   : > { %1807 = vmatprep.mubr.f32.mxu1 %v2756_v57 }
 0x303   : > { %1808 = vmatmul.mubr.f32.gmra.mrb[54].mxu1 %v1468_v39  ;;  %v1508_v7 = vpop.trf.xlu1 }
 0x304   : > { %1813 = vmatprep.mubr.f32.mxu1 %v2756_v57 }
 0x307   : > { %1814 = vmatmul.mubr.f32.gmra.mrb[56].mxu1 %v1469_v29 }
 0x308   : > { %1819 = vmatprep.mubr.f32.mxu1 %v2756_v57 }
 0x30b   : > { %1820 = vmatmul.mubr.f32.gmra.mrb[58].mxu1 %v1470_v30 }
 0x30c   : > { %1825 = vmatprep.mubr.f32.mxu1 %v2756_v57 }
 0x30f   : > { %1826 = vmatmul.mubr.f32.gmra.mrb[60].mxu1 %v1471_v49 }
 0x310   : > { %1831 = vmatprep.mubr.f32.mxu1 %v2756_v57 }
 0x313   : > { %1832 = vmatmul.mubr.f32.gmra.mrb[62].mxu1 %v1472_v4 }
 0x314   : > { %1837 = vmatprep.mubr.f32.mxu1 %v2756_v57 }
 0x317   : > { %1838 = vmatmul.mubr.f32.gmra.mrb[64].mxu1 %v1473_v50 }
 0x318   : > { %1843 = vmatprep.mubr.f32.mxu1 %v2756_v57 }
 0x31b   : > { %1844 = vmatmul.mubr.f32.gmra.mrb[66].mxu1 %v1474_v48 }
 0x31c   : > { %1849 = vmatprep.mubr.f32.mxu1 %v2756_v57 }
 0x31f   : > { %1850 = vmatmul.mubr.f32.gmra.mrb[68].mxu1 %v1475_v20 }
 0x320   : > { %1855 = vmatprep.mubr.f32.mxu1 %v2756_v57 }
 0x323   : > { %1856 = vmatmul.mubr.f32.gmra.mrb[70].mxu1 %v1476_v8 }
 0x324   : > { %1861 = vmatprep.mubr.f32.mxu1 %v2756_v57 }
 0x327   : > { %1862 = vmatmul.mubr.f32.gmra.mrb[72].mxu1 %v1493_v52 }
 0x328   : > { %1867 = vmatprep.mubr.f32.mxu1 %v2756_v57 }
 0x32b   : > { %1868 = vmatmul.mubr.f32.gmra.mrb[74].mxu1 %v1494_v53 }
 0x32c   : > { %1873 = vmatprep.mubr.f32.mxu1 %v2756_v57 }
 0x32f   : > { %1874 = vmatmul.mubr.f32.gmra.mrb[76].mxu1 %v1495_v56 }
 0x330   : > { %1879 = vmatprep.mubr.f32.mxu1 %v2756_v57 }
 0x333   : > { %1880 = vmatmul.mubr.f32.gmra.mrb[78].mxu1 %v1496_v9 }
 0x334   : > { %1885 = vmatprep.mubr.f32.mxu1 %v2756_v57 }
 0x337   : > { %1886 = vmatmul.mubr.f32.gmra.mrb[80].mxu1 %v1497_v61 }
 0x338   : > { %1891 = vmatprep.mubr.f32.mxu1 %v2756_v57 }
 0x33b   : > { %1892 = vmatmul.mubr.f32.gmra.mrb[82].mxu1 %v1498_v63 }
 0x33c   : > { %1897 = vmatprep.mubr.f32.mxu1 %v2756_v57 }
 0x33f   : > { %1898 = vmatmul.mubr.f32.gmra.mrb[84].mxu1 %v1499_v1 }
 0x340   : > { %1903 = vmatprep.mubr.f32.mxu1 %v2756_v57 }
 0x343   : > { %1904 = vmatmul.mubr.f32.gmra.mrb[86].mxu1 %v1500_v13 }
 0x344   : > { %1909 = vmatprep.mubr.f32.mxu1 %v2756_v57 }
 0x347   : > { %1910 = vmatmul.mubr.f32.gmra.mrb[88].mxu1 %v1501_v59 }
 0x348   : > { %1915 = vmatprep.mubr.f32.mxu1 %v2756_v57 }
 0x34b   : > { %1916 = vmatmul.mubr.f32.gmra.mrb[90].mxu1 %v1502_v3 }
 0x34c   : > { %1921 = vmatprep.mubr.f32.mxu1 %v2756_v57 }
 0x34f   : > { %1922 = vmatmul.mubr.f32.gmra.mrb[92].mxu1 %v1503_v54 }
 0x350   : > { %1927 = vmatprep.mubr.f32.mxu1 %v2756_v57 }
 0x353   : > { %1928 = vmatmul.mubr.f32.gmra.mrb[94].mxu1 %v1504_v5 }
 0x354   : > { %1933 = vmatprep.mubr.f32.mxu1 %v2756_v57 }
 0x357   : > { %1934 = vmatmul.mubr.f32.gmra.mrb[96].mxu1 %v1505_v6 }
 0x358   : > { %1939 = vmatprep.mubr.f32.mxu1 %v2756_v57 }
 0x35b   : > { %1940 = vmatmul.mubr.f32.gmra.mrb[98].mxu1 %v1506_v17 }
 0x35c   : > { %1945 = vmatprep.mubr.f32.mxu1 %v2756_v57 }
 0x35f   : > { %1946 = vmatmul.mubr.f32.gmra.mrb[100].mxu1 %v1507_v0 }
 0x360   : > { %1951 = vmatprep.mubr.f32.mxu1 %v2756_v57 }
 0x363   : > { %1952 = vmatmul.mubr.f32.gmra.mrb[102].mxu1 %v1508_v7 }
 0x36a   : > { %v1575_v10 = vpop.f32.mrb[58].mxu0  ;;  %v1647_v11 = vpop.f32.mrb[0].mxu1 }
 0x36b   : > { %1958 = vst [vmem:[%s3461_s11] sm:$0xff] %v1575_v10  ;;  %1982 = vst [vmem:[%s3461_s11 + $0xc0] sm:$0xff] %v1647_v11  ;;  %v1577_v14 = vpop.f32.mrb[59].mxu0  ;;  %v1649_v57 = vpop.f32.mrb[1].mxu1 }
 0x36c   : > { %1959 = vst [vmem:[%s3461_s11 + $0x8] sm:$0xff] %v1577_v14  ;;  %1983 = vst [vmem:[%s3461_s11 + $0xc8] sm:$0xff] %v1649_v57 }
 0x36e   : > { %v1581_v44 = vpop.f32.mrb[60].mxu0  ;;  %v1653_v15 = vpop.f32.mrb[2].mxu1 }
 0x36f   : > { %1960 = vst [vmem:[%s3461_s11 + $0x10] sm:$0xff] %v1581_v44  ;;  %1984 = vst [vmem:[%s3461_s11 + $0xd0] sm:$0xff] %v1653_v15  ;;  %v1583_v16 = vpop.f32.mrb[61].mxu0  ;;  %v1655_v40 = vpop.f32.mrb[3].mxu1 }
 0x370   : > { %1961 = vst [vmem:[%s3461_s11 + $0x18] sm:$0xff] %v1583_v16  ;;  %1985 = vst [vmem:[%s3461_s11 + $0xd8] sm:$0xff] %v1655_v40 }
 0x372   : > { %v1587_v28 = vpop.f32.mrb[62].mxu0  ;;  %v1659_v25 = vpop.f32.mrb[4].mxu1 }
 0x373   : > { %1962 = vst [vmem:[%s3461_s11 + $0x20] sm:$0xff] %v1587_v28  ;;  %1986 = vst [vmem:[%s3461_s11 + $0xe0] sm:$0xff] %v1659_v25  ;;  %v1589_v36 = vpop.f32.mrb[63].mxu0  ;;  %v1661_v18 = vpop.f32.mrb[5].mxu1 }
 0x374   : > { %1963 = vst [vmem:[%s3461_s11 + $0x28] sm:$0xff] %v1589_v36  ;;  %1987 = vst [vmem:[%s3461_s11 + $0xe8] sm:$0xff] %v1661_v18 }
 0x376   : > { %v1593_v21 = vpop.f32.mrb[64].mxu0  ;;  %v1665_v22 = vpop.f32.mrb[6].mxu1 }
 0x377   : > { %1964 = vst [vmem:[%s3461_s11 + $0x30] sm:$0xff] %v1593_v21  ;;  %1988 = vst [vmem:[%s3461_s11 + $0xf0] sm:$0xff] %v1665_v22  ;;  %v1595_v45 = vpop.f32.mrb[65].mxu0  ;;  %v1667_v24 = vpop.f32.mrb[7].mxu1 }
 0x378   : > { %1965 = vst [vmem:[%s3461_s11 + $0x38] sm:$0xff] %v1595_v45  ;;  %1989 = vst [vmem:[%s3461_s11 + $0xf8] sm:$0xff] %v1667_v24 }
 0x37a   : > { %v1599_v41 = vpop.f32.mrb[66].mxu0  ;;  %v1671_v55 = vpop.f32.mrb[8].mxu1 }
 0x37b   : > { %1966 = vst [vmem:[%s3461_s11 + $0x40] sm:$0xff] %v1599_v41  ;;  %1990 = vst [vmem:[%s3461_s11 + $0x100] sm:$0xff] %v1671_v55  ;;  %v1601_v60 = vpop.f32.mrb[67].mxu0  ;;  %v1673_v32 = vpop.f32.mrb[9].mxu1 }
 0x37c   : > { %1967 = vst [vmem:[%s3461_s11 + $0x48] sm:$0xff] %v1601_v60  ;;  %1991 = vst [vmem:[%s3461_s11 + $0x108] sm:$0xff] %v1673_v32 }
 0x37e   : > { %v1605_v51 = vpop.f32.mrb[68].mxu0  ;;  %v1677_v34 = vpop.f32.mrb[10].mxu1 }
 0x37f   : > { %1968 = vst [vmem:[%s3461_s11 + $0x50] sm:$0xff] %v1605_v51  ;;  %1992 = vst [vmem:[%s3461_s11 + $0x110] sm:$0xff] %v1677_v34  ;;  %v1607_v37 = vpop.f32.mrb[69].mxu0  ;;  %v1679_v42 = vpop.f32.mrb[11].mxu1 }
 0x380   : > { %1969 = vst [vmem:[%s3461_s11 + $0x58] sm:$0xff] %v1607_v37  ;;  %1993 = vst [vmem:[%s3461_s11 + $0x118] sm:$0xff] %v1679_v42 }
 0x382   : > { %v1611_v2 = vpop.f32.mrb[70].mxu0  ;;  %v1683_v12 = vpop.f32.mrb[12].mxu1 }
 0x383   : > { %1970 = vst [vmem:[%s3461_s11 + $0x60] sm:$0xff] %v1611_v2  ;;  %1994 = vst [vmem:[%s3461_s11 + $0x120] sm:$0xff] %v1683_v12  ;;  %v1613_v47 = vpop.f32.mrb[71].mxu0  ;;  %v1685_v43 = vpop.f32.mrb[13].mxu1 }
 0x384   : > { %1971 = vst [vmem:[%s3461_s11 + $0x68] sm:$0xff] %v1613_v47  ;;  %1995 = vst [vmem:[%s3461_s11 + $0x128] sm:$0xff] %v1685_v43 }
 0x386   : > { %v1617_v19 = vpop.f32.mrb[72].mxu0  ;;  %v1689_v23 = vpop.f32.mrb[14].mxu1 }
 0x387   : > { %1972 = vst [vmem:[%s3461_s11 + $0x70] sm:$0xff] %v1617_v19  ;;  %1996 = vst [vmem:[%s3461_s11 + $0x130] sm:$0xff] %v1689_v23  ;;  %v1619_v38 = vpop.f32.mrb[73].mxu0  ;;  %v1691_v58 = vpop.f32.mrb[15].mxu1 }
 0x388   : > { %1973 = vst [vmem:[%s3461_s11 + $0x78] sm:$0xff] %v1619_v38  ;;  %1997 = vst [vmem:[%s3461_s11 + $0x138] sm:$0xff] %v1691_v58 }
 0x38a   : > { %v1623_v62 = vpop.f32.mrb[74].mxu0  ;;  %v1695_v31 = vpop.f32.mrb[16].mxu1 }
 0x38b   : > { %1974 = vst [vmem:[%s3461_s11 + $0x80] sm:$0xff] %v1623_v62  ;;  %1998 = vst [vmem:[%s3461_s11 + $0x140] sm:$0xff] %v1695_v31  ;;  %v1625_v46 = vpop.f32.mrb[75].mxu0  ;;  %v1697_v33 = vpop.f32.mrb[17].mxu1 }
 0x38c   : > { %1975 = vst [vmem:[%s3461_s11 + $0x88] sm:$0xff] %v1625_v46  ;;  %1999 = vst [vmem:[%s3461_s11 + $0x148] sm:$0xff] %v1697_v33 }
 0x38e   : > { %v1629_v27 = vpop.f32.mrb[76].mxu0  ;;  %v1701_v26 = vpop.f32.mrb[18].mxu1 }
 0x38f   : > { %1976 = vst [vmem:[%s3461_s11 + $0x90] sm:$0xff] %v1629_v27  ;;  %2000 = vst [vmem:[%s3461_s11 + $0x150] sm:$0xff] %v1701_v26  ;;  %v1631_v35 = vpop.f32.mrb[77].mxu0  ;;  %v1703_v39 = vpop.f32.mrb[19].mxu1 }
 0x390   : > { %1977 = vst [vmem:[%s3461_s11 + $0x98] sm:$0xff] %v1631_v35  ;;  %2001 = vst [vmem:[%s3461_s11 + $0x158] sm:$0xff] %v1703_v39 }
 0x392   : > { %v1635_v29 = vpop.f32.mrb[78].mxu0  ;;  %v1707_v30 = vpop.f32.mrb[20].mxu1 }
 0x393   : > { %1978 = vst [vmem:[%s3461_s11 + $0xa0] sm:$0xff] %v1635_v29  ;;  %2002 = vst [vmem:[%s3461_s11 + $0x160] sm:$0xff] %v1707_v30  ;;  %v1637_v49 = vpop.f32.mrb[79].mxu0  ;;  %v1709_v52 = vpop.f32.mrb[21].mxu1 }
 0x394   : > { %1979 = vst [vmem:[%s3461_s11 + $0xa8] sm:$0xff] %v1637_v49  ;;  %2003 = vst [vmem:[%s3461_s11 + $0x168] sm:$0xff] %v1709_v52 }
 0x396   : > { %v1641_v4 = vpop.f32.mrb[80].mxu0  ;;  %v1713_v53 = vpop.f32.mrb[22].mxu1 }
 0x397   : > { %1980 = vst [vmem:[%s3461_s11 + $0xb0] sm:$0xff] %v1641_v4  ;;  %2004 = vst [vmem:[%s3461_s11 + $0x170] sm:$0xff] %v1713_v53  ;;  %v1643_v50 = vpop.f32.mrb[81].mxu0  ;;  %v1715_v56 = vpop.f32.mrb[23].mxu1 }
 0x398   : > { %1981 = vst [vmem:[%s3461_s11 + $0xb8] sm:$0xff] %v1643_v50  ;;  %2005 = vst [vmem:[%s3461_s11 + $0x178] sm:$0xff] %v1715_v56 }
 0x39a   : > { %v1719_v48 = vpop.f32.mrb[24].mxu1 }
 0x39b   : > { %2006 = vst [vmem:[%s3461_s11 + $0x180] sm:$0xff] %v1719_v48  ;;  %v1721_v9 = vpop.f32.mrb[25].mxu1 }
 0x39c   : > { %2007 = vst [vmem:[%s3461_s11 + $0x188] sm:$0xff] %v1721_v9 }
 0x39e   : > { %v1725_v20 = vpop.f32.mrb[26].mxu1 }
 0x39f   : > { %2008 = vst [vmem:[%s3461_s11 + $0x190] sm:$0xff] %v1725_v20  ;;  %v1727_v61 = vpop.f32.mrb[27].mxu1 }
 0x3a0   : > { %2009 = vst [vmem:[%s3461_s11 + $0x198] sm:$0xff] %v1727_v61 }
 0x3a2   : > { %v1731_v8 = vpop.f32.mrb[28].mxu1 }
 0x3a3   : > { %2010 = vst [vmem:[%s3461_s11 + $0x1a0] sm:$0xff] %v1731_v8  ;;  %v1733_v63 = vpop.f32.mrb[29].mxu1 }
 0x3a4   : > { %2011 = vst [vmem:[%s3461_s11 + $0x1a8] sm:$0xff] %v1733_v63 }
 0x3a6   : > { %v1737_v1 = vpop.f32.mrb[30].mxu1 }
 0x3a7   : > { %2012 = vst [vmem:[%s3461_s11 + $0x1b0] sm:$0xff] %v1737_v1  ;;  %v1739_v13 = vpop.f32.mrb[31].mxu1 }
 0x3a8   : > { %2013 = vst [vmem:[%s3461_s11 + $0x1b8] sm:$0xff] %v1739_v13 }
 0x3aa   : > { %v1743_v59 = vpop.f32.mrb[32].mxu1 }
 0x3ab   : > { %2014 = vst [vmem:[%s3461_s11 + $0x1c0] sm:$0xff] %v1743_v59  ;;  %v1745_v3 = vpop.f32.mrb[33].mxu1 }
 0x3ac   : > { %2015 = vst [vmem:[%s3461_s11 + $0x1c8] sm:$0xff] %v1745_v3 }
 0x3ae   : > { %v1749_v54 = vpop.f32.mrb[34].mxu1 }
 0x3af   : > { %2016 = vst [vmem:[%s3461_s11 + $0x1d0] sm:$0xff] %v1749_v54  ;;  %v1751_v5 = vpop.f32.mrb[35].mxu1 }
 0x3b0   : > { %2017 = vst [vmem:[%s3461_s11 + $0x1d8] sm:$0xff] %v1751_v5 }
 0x3b2   : > { %v1755_v6 = vpop.f32.mrb[36].mxu1 }
 0x3b3   : > { %2018 = vst [vmem:[%s3461_s11 + $0x1e0] sm:$0xff] %v1755_v6  ;;  %v1757_v17 = vpop.f32.mrb[37].mxu1 }
 0x3b4   : > { %2019 = vst [vmem:[%s3461_s11 + $0x1e8] sm:$0xff] %v1757_v17 }
 0x3b6   : > { %v1761_v0 = vpop.f32.mrb[38].mxu1 }
 0x3b7   : > { %2020 = vst [vmem:[%s3461_s11 + $0x1f0] sm:$0xff] %v1761_v0  ;;  %v1763_v7 = vpop.f32.mrb[39].mxu1 }
 0x3b8   : > { %2021 = vst [vmem:[%s3461_s11 + $0x1f8] sm:$0xff] %v1763_v7 }
 0x3ba   : > { %v1767_v10 = vpop.f32.mrb[40].mxu1 }
 0x3bb   : > { %2022 = vst [vmem:[%s3461_s11 + $0x200] sm:$0xff] %v1767_v10  ;;  %v1769_v11 = vpop.f32.mrb[41].mxu1 }
 0x3bc   : > { %2023 = vst [vmem:[%s3461_s11 + $0x208] sm:$0xff] %v1769_v11 }
 0x3be   : > { %v1773_v14 = vpop.f32.mrb[42].mxu1 }
 0x3bf   : > { %2024 = vst [vmem:[%s3461_s11 + $0x210] sm:$0xff] %v1773_v14  ;;  %v1775_v57 = vpop.f32.mrb[43].mxu1 }
 0x3c0   : > { %2025 = vst [vmem:[%s3461_s11 + $0x218] sm:$0xff] %v1775_v57 }
 0x3c2   : > { %v1779_v44 = vpop.f32.mrb[44].mxu1 }
 0x3c3   : > { %2026 = vst [vmem:[%s3461_s11 + $0x220] sm:$0xff] %v1779_v44  ;;  %v1781_v15 = vpop.f32.mrb[45].mxu1 }
 0x3c4   : > { %2027 = vst [vmem:[%s3461_s11 + $0x228] sm:$0xff] %v1781_v15 }
 0x3c6   : > { %v1785_v16 = vpop.f32.mrb[46].mxu1 }
 0x3c7   : > { %2028 = vst [vmem:[%s3461_s11 + $0x230] sm:$0xff] %v1785_v16  ;;  %v1787_v40 = vpop.f32.mrb[47].mxu1 }
 0x3c8   : > { %2029 = vst [vmem:[%s3461_s11 + $0x238] sm:$0xff] %v1787_v40 }
 0x3ca   : > { %v1791_v28 = vpop.f32.mrb[48].mxu1 }
 0x3cb   : > { %2030 = vst [vmem:[%s3461_s11 + $0x240] sm:$0xff] %v1791_v28  ;;  %v1793_v25 = vpop.f32.mrb[49].mxu1 }
 0x3cc   : > { %2031 = vst [vmem:[%s3461_s11 + $0x248] sm:$0xff] %v1793_v25 }
 0x3ce   : > { %v1797_v36 = vpop.f32.mrb[50].mxu1 }
 0x3cf   : > { %2032 = vst [vmem:[%s3461_s11 + $0x250] sm:$0xff] %v1797_v36  ;;  %v1799_v18 = vpop.f32.mrb[51].mxu1 }
 0x3d0   : > { %2033 = vst [vmem:[%s3461_s11 + $0x258] sm:$0xff] %v1799_v18 }
 0x3d2   : > { %v1803_v21 = vpop.f32.mrb[52].mxu1 }
 0x3d3   : > { %2034 = vst [vmem:[%s3461_s11 + $0x260] sm:$0xff] %v1803_v21  ;;  %v1805_v22 = vpop.f32.mrb[53].mxu1 }
 0x3d4   : > { %2035 = vst [vmem:[%s3461_s11 + $0x268] sm:$0xff] %v1805_v22 }
 0x3d6   : > { %v1809_v45 = vpop.f32.mrb[54].mxu1 }
 0x3d7   : > { %2036 = vst [vmem:[%s3461_s11 + $0x270] sm:$0xff] %v1809_v45  ;;  %v1811_v24 = vpop.f32.mrb[55].mxu1 }
 0x3d8   : > { %2037 = vst [vmem:[%s3461_s11 + $0x278] sm:$0xff] %v1811_v24 }
 0x3da   : > { %v1815_v41 = vpop.f32.mrb[56].mxu1 }
 0x3db   : > { %2038 = vst [vmem:[%s3461_s11 + $0x280] sm:$0xff] %v1815_v41  ;;  %v1817_v55 = vpop.f32.mrb[57].mxu1 }
 0x3dc   : > { %2039 = vst [vmem:[%s3461_s11 + $0x288] sm:$0xff] %v1817_v55 }
 0x3de   : > { %v1821_v60 = vpop.f32.mrb[58].mxu1 }
 0x3df   : > { %2040 = vst [vmem:[%s3461_s11 + $0x290] sm:$0xff] %v1821_v60  ;;  %v1823_v32 = vpop.f32.mrb[59].mxu1 }
 0x3e0   : > { %2041 = vst [vmem:[%s3461_s11 + $0x298] sm:$0xff] %v1823_v32 }
 0x3e2   : > { %v1827_v51 = vpop.f32.mrb[60].mxu1 }
 0x3e3   : > { %2042 = vst [vmem:[%s3461_s11 + $0x2a0] sm:$0xff] %v1827_v51  ;;  %v1829_v34 = vpop.f32.mrb[61].mxu1 }
 0x3e4   : > { %2043 = vst [vmem:[%s3461_s11 + $0x2a8] sm:$0xff] %v1829_v34 }
 0x3e6   : > { %v1833_v37 = vpop.f32.mrb[62].mxu1 }
 0x3e7   : > { %2044 = vst [vmem:[%s3461_s11 + $0x2b0] sm:$0xff] %v1833_v37  ;;  %v1835_v42 = vpop.f32.mrb[63].mxu1 }
 0x3e8   : > { %2045 = vst [vmem:[%s3461_s11 + $0x2b8] sm:$0xff] %v1835_v42 }
 0x3ea   : > { %v1839_v2 = vpop.f32.mrb[64].mxu1 }
 0x3eb   : > { %2046 = vst [vmem:[%s3461_s11 + $0x2c0] sm:$0xff] %v1839_v2  ;;  %v1841_v12 = vpop.f32.mrb[65].mxu1 }
 0x3ec   : > { %2047 = vst [vmem:[%s3461_s11 + $0x2c8] sm:$0xff] %v1841_v12 }
 0x3ee   : > { %v1845_v47 = vpop.f32.mrb[66].mxu1 }
 0x3ef   : > { %2048 = vst [vmem:[%s3461_s11 + $0x2d0] sm:$0xff] %v1845_v47  ;;  %v1847_v43 = vpop.f32.mrb[67].mxu1 }
 0x3f0   : > { %2049 = vst [vmem:[%s3461_s11 + $0x2d8] sm:$0xff] %v1847_v43 }
 0x3f2   : > { %v1851_v19 = vpop.f32.mrb[68].mxu1 }
 0x3f3   : > { %2050 = vst [vmem:[%s3461_s11 + $0x2e0] sm:$0xff] %v1851_v19  ;;  %v1853_v23 = vpop.f32.mrb[69].mxu1 }
 0x3f4   : > { %2051 = vst [vmem:[%s3461_s11 + $0x2e8] sm:$0xff] %v1853_v23 }
 0x3f6   : > { %v1857_v38 = vpop.f32.mrb[70].mxu1 }
 0x3f7   : > { %2052 = vst [vmem:[%s3461_s11 + $0x2f0] sm:$0xff] %v1857_v38  ;;  %v1859_v58 = vpop.f32.mrb[71].mxu1 }
 0x3f8   : > { %2053 = vst [vmem:[%s3461_s11 + $0x2f8] sm:$0xff] %v1859_v58 }
 0x3fa   : > { %v1863_v62 = vpop.f32.mrb[72].mxu1 }
 0x3fb   : > { %2054 = vst [vmem:[%s3461_s11 + $0x300] sm:$0xff] %v1863_v62  ;;  %v1865_v31 = vpop.f32.mrb[73].mxu1 }
 0x3fc   : > { %2055 = vst [vmem:[%s3461_s11 + $0x308] sm:$0xff] %v1865_v31 }
 0x3fe   : > { %v1869_v46 = vpop.f32.mrb[74].mxu1 }
 0x3ff   : > { %2056 = vst [vmem:[%s3461_s11 + $0x310] sm:$0xff] %v1869_v46  ;;  %v1871_v33 = vpop.f32.mrb[75].mxu1 }
 0x400   : > { %2057 = vst [vmem:[%s3461_s11 + $0x318] sm:$0xff] %v1871_v33 }
 0x402   : > { %v1875_v27 = vpop.f32.mrb[76].mxu1 }
 0x403   : > { %2058 = vst [vmem:[%s3461_s11 + $0x320] sm:$0xff] %v1875_v27  ;;  %v1877_v26 = vpop.f32.mrb[77].mxu1 }
 0x404   : > { %2059 = vst [vmem:[%s3461_s11 + $0x328] sm:$0xff] %v1877_v26 }
 0x406   : > { %v1881_v35 = vpop.f32.mrb[78].mxu1 }
 0x407   : > { %2060 = vst [vmem:[%s3461_s11 + $0x330] sm:$0xff] %v1881_v35  ;;  %v1883_v39 = vpop.f32.mrb[79].mxu1 }
 0x408   : > { %2061 = vst [vmem:[%s3461_s11 + $0x338] sm:$0xff] %v1883_v39 }
 0x40a   : > { %v1887_v29 = vpop.f32.mrb[80].mxu1 }
 0x40b   : > { %2062 = vst [vmem:[%s3461_s11 + $0x340] sm:$0xff] %v1887_v29  ;;  %v1889_v30 = vpop.f32.mrb[81].mxu1 }
 0x40c   : > { %2063 = vst [vmem:[%s3461_s11 + $0x348] sm:$0xff] %v1889_v30 }
 0x40e   : > { %v1893_v49 = vpop.f32.mrb[82].mxu1 }
 0x40f   : > { %2064 = vst [vmem:[%s3461_s11 + $0x350] sm:$0xff] %v1893_v49  ;;  %v1895_v52 = vpop.f32.mrb[83].mxu1 }
 0x410   : > { %2065 = vst [vmem:[%s3461_s11 + $0x358] sm:$0xff] %v1895_v52 }
 0x412   : > { %v1899_v4 = vpop.f32.mrb[84].mxu1 }
 0x413   : > { %2066 = vst [vmem:[%s3461_s11 + $0x360] sm:$0xff] %v1899_v4  ;;  %v1901_v53 = vpop.f32.mrb[85].mxu1 }
 0x414   : > { %2067 = vst [vmem:[%s3461_s11 + $0x368] sm:$0xff] %v1901_v53 }
 0x416   : > { %v1905_v50 = vpop.f32.mrb[86].mxu1 }
 0x417   : > { %2068 = vst [vmem:[%s3461_s11 + $0x370] sm:$0xff] %v1905_v50  ;;  %v1907_v56 = vpop.f32.mrb[87].mxu1 }
 0x418   : > { %2069 = vst [vmem:[%s3461_s11 + $0x378] sm:$0xff] %v1907_v56 }
 0x41a   : > { %v1911_v48 = vpop.f32.mrb[88].mxu1 }
 0x41b   : > { %2070 = vst [vmem:[%s3461_s11 + $0x380] sm:$0xff] %v1911_v48  ;;  %v1913_v9 = vpop.f32.mrb[89].mxu1 }
 0x41c   : > { %2071 = vst [vmem:[%s3461_s11 + $0x388] sm:$0xff] %v1913_v9 }
 0x41e   : > { %v1917_v20 = vpop.f32.mrb[90].mxu1 }
 0x41f   : > { %2072 = vst [vmem:[%s3461_s11 + $0x390] sm:$0xff] %v1917_v20  ;;  %v1919_v61 = vpop.f32.mrb[91].mxu1 }
 0x420   : > { %2073 = vst [vmem:[%s3461_s11 + $0x398] sm:$0xff] %v1919_v61 }
 0x422   : > { %v1923_v8 = vpop.f32.mrb[92].mxu1 }
 0x423   : > { %2074 = vst [vmem:[%s3461_s11 + $0x3a0] sm:$0xff] %v1923_v8  ;;  %v1925_v63 = vpop.f32.mrb[93].mxu1 }
 0x424   : > { %2075 = vst [vmem:[%s3461_s11 + $0x3a8] sm:$0xff] %v1925_v63 }
 0x426   : > { %v1929_v1 = vpop.f32.mrb[94].mxu1 }
 0x427   : > { %2076 = vst [vmem:[%s3461_s11 + $0x3b0] sm:$0xff] %v1929_v1  ;;  %v1931_v13 = vpop.f32.mrb[95].mxu1 }
 0x428   : > { %2077 = vst [vmem:[%s3461_s11 + $0x3b8] sm:$0xff] %v1931_v13 }
 0x42a   : > { %v1935_v59 = vpop.f32.mrb[96].mxu1 }
 0x42b   : > { %2078 = vst [vmem:[%s3461_s11 + $0x3c0] sm:$0xff] %v1935_v59  ;;  %v1937_v3 = vpop.f32.mrb[97].mxu1 }
 0x42c   : > { %2079 = vst [vmem:[%s3461_s11 + $0x3c8] sm:$0xff] %v1937_v3 }
 0x42e   : > { %v1941_v54 = vpop.f32.mrb[98].mxu1 }
 0x42f   : > { %2080 = vst [vmem:[%s3461_s11 + $0x3d0] sm:$0xff] %v1941_v54  ;;  %v1943_v5 = vpop.f32.mrb[99].mxu1 }
 0x430   : > { %2081 = vst [vmem:[%s3461_s11 + $0x3d8] sm:$0xff] %v1943_v5 }
 0x432   : > { %v1947_v6 = vpop.f32.mrb[100].mxu1 }
 0x433   : > { %2082 = vst [vmem:[%s3461_s11 + $0x3e0] sm:$0xff] %v1947_v6  ;;  %v1949_v17 = vpop.f32.mrb[101].mxu1 }
 0x434   : > { %2083 = vst [vmem:[%s3461_s11 + $0x3e8] sm:$0xff] %v1949_v17 }
 0x436   : > { %v1953_v0 = vpop.f32.mrb[102].mxu1 }
 0x437   : > { %2084 = vst [vmem:[%s3461_s11 + $0x3f0] sm:$0xff] %v1953_v0  ;;  %v1955_v7 = vpop.f32.mrb[103].mxu1 }
 0x438   : > { %2085 = vst [vmem:[%s3461_s11 + $0x3f8] sm:$0xff] %v1955_v7 }
 0x439   : > { %2675 = shalt.err (!%p2672_p9)
}
 0x43a   : > { %s2676_s6 = scalar_lea.hbm %s3594_s21, 16384  ;;  %s2680_s24 = scalar_lea.hbm %s3649_s2, 32768 }
 0x43b   : > { %p2677_p1 = scmp.ne.s32.totalorder %s3594_s21, %s2676_s6  ;;  %p2681_p7 = scmp.lt.u32.totalorder %s3594_s21, %s3649_s2 }
 0x43c   : > { %p2682_p13 = scmp.lt.u32.totalorder %s2680_s24, %s2676_s6  ;;  %p2684_p6 = scmp.lt.u32.totalorder %s2676_s6, %s3594_s21 }
 0x43d   : > { %p2678_p2 = pnand %p2677_p1, %p2876_p10 }
 0x43e   : > { %p2683_p4 = por %p2682_p13, %p2681_p7 }
 0x43f   : > { %p2679_p3 = pneg %p2678_p2 }
 0x440   : > { %p2685_p8 = por %p2684_p6, %p2683_p4 }
 0x442   : > { %p2686_p12 = pnand %p2685_p8, %p2679_p3 }
 0x444   : > { %2689 = shalt.err (!%p2686_p12)
}
 0x445   : > { %s2758_s11 = smov 256   ;;  %s2759_s18 = smov 16  }
 0x446   : > { %2490 = dma.vmem_to_hbm [thread:$0]  (%p2876_p10), %s3596_s26, 16384, %s3594_s21, %s2087_s19, %s2758_s11, %s2758_s11, %s2759_s18  }
 0x447 PF: > { %s2130_s7 = sand.u32 1, %s2728_s12   ;;  %p3668_p11 = scmp.ne.s32.totalorder %s3658_s23, 0 }
 0x448   : > { %p3669_p0 = scmp.ge.s32.totalorder %s2748_s17, 2  ;;  %s2131_s8 = scalar_lea.sflag [#allocation4], %s2130_s7 }
 0x44a   : > { %p2501_p5 = pnand %p3669_p0, %p3668_p11 }
 0x44c   : > { %2723 = dma.done.wait (!%p2501_p5), %s2131_s8, 16384  }
 0x44d   : > { %2725 = vsyncadd (!%p2501_p5), %s2131_s8, 4294950912  ;;  %s21_s17 = sadd.s32 1, %s2748_s17   ;;  %s3670_s12 = smov %s2732_s13 }
 0x44e   : > { %p18_p9 = scmp.ge.s32.totalorder %s21_s17, 4   ;;  %s3671_s13 = smov %s2736_s14 }
 0x44f   : > { %s3672_s14 = smov %s2885_s5  ;;  %s3673_s15 = smov %s2744_s16 }
 0x450   : > { %s3674_s16 = smov %s3676_s28  ;;  %20 = sbr.rel (!%p18_p9) target bundleno = 7 (0x7), region = 89 }
 0x457   :  { %2148 = vsyncpa [#allocation3], 1 }
 0x458   :  { %2150 = vsyncpa [#allocation3 + $0x1], 1 }
 0x459   :  { %2151 = vsyncpa [#allocation6], 1 }
 0x45a   :  { %2152 = vsyncpa [#allocation4], 1 }
 0x45b   :  { %2154 = vsyncpa [#allocation4 + $0x1], 1 }

</bundles_post_ra>
